<compile_context>
chip_gen: v7x
topology: tpu7x:2x2x1
jax: 0.10.0
libtpu: 0.0.40
codegen_flags: <defaults>
</compile_context>

<pallas_src>
import jax
import jax.numpy as jnp
from jax.experimental import pallas as pl
from jax.experimental.pallas import tpu as pltpu


def _lstm_fc_kernel(x_ref, wih_ref, whh_ref, b_ref, wfc_ref, bfc_ref,
                    out_ref, xw_sc):
    """Single-invocation LSTM recurrence + final FC.

    x_ref   : (T*B, Dp)  time-major-flattened input, bf16, D zero-padded to Dp
    wih_ref : (Dp, 4H)   W_ih^T, bf16, zero-padded rows
    whh_ref : (H, 4H)    W_hh^T, bf16
    b_ref   : (1, 4H)    b_ih + b_hh, f32
    wfc_ref : (H, Cp)    W_fc^T zero-padded to lane width (Cp = 128), f32
    bfc_ref : (1, Cp)    b_fc zero-padded, f32
    out_ref : (B, Cp)    logits (padded; wrapper slices to C), f32
    xw_sc   : (T*B, 4H)  VMEM scratch for the hoisted input projection, f32
    """
    H = whh_ref.shape[0]
    B = out_ref.shape[0]
    T = xw_sc.shape[0] // B

    # Hoisted input projection + folded bias: one big parallel matmul
    # (bf16 operands, f32 accumulation), off the recurrent critical path.
    xw_sc[...] = (jnp.dot(x_ref[...], wih_ref[...],
                          preferred_element_type=jnp.float32)
                  + b_ref[...])

    def sigmoid(v):
        # Single EUP dispatch (tanh) instead of exp + reciprocal.
        return 0.5 * (jnp.tanh(0.5 * v) + 1.0)

    def activations(gates):
        i_g = sigmoid(gates[:, 0 * H:1 * H])
        f_g = sigmoid(gates[:, 1 * H:2 * H])
        g_g = jnp.tanh(gates[:, 2 * H:3 * H])
        o_g = sigmoid(gates[:, 3 * H:4 * H])
        return i_g, f_g, g_g, o_g

    # Peeled step 0: h0 = c0 = 0, so there is no recurrent matmul and the
    # forget-gate term vanishes.
    g0 = xw_sc[pl.ds(0, B), :]
    i0, _, gg0, o0 = activations(g0)
    c = i0 * gg0
    h = o0 * jnp.tanh(c)

    def step(t, carry):
        h, c = carry
        gx = xw_sc[pl.ds(t * B, B), :]                       # (B, 4H) f32
        # W_hh streamed from VMEM each step (bf16) instead of being pinned in
        # vregs; h cast to bf16 for the MXU, accumulation stays f32.
        gates = gx + jnp.dot(h.astype(jnp.bfloat16), whh_ref[...],
                             preferred_element_type=jnp.float32)
        i_g, f_g, g_g, o_g = activations(gates)
        c_new = f_g * c + i_g * g_g
        h_new = o_g * jnp.tanh(c_new)
        return h_new, c_new

    h_T, _ = jax.lax.fori_loop(1, T, step, (h, c), unroll=True)

    # Final FC on the last hidden state (once, off the critical path, f32).
    out_ref[...] = (jnp.dot(h_T, wfc_ref[...],
                            preferred_element_type=jnp.float32)
                    + bfc_ref[...]).astype(out_ref.dtype)


@jax.jit
def face_lstm_forward(x, w_ih, w_hh, b_ih, b_hh, w_fc, b_fc):
    """x: (B, 1, T, D) float32 (matches the PyTorch input before .squeeze(1))."""
    x = jnp.squeeze(x, axis=1)                       # (B, T, D)
    B, T, D = x.shape
    H = w_hh.shape[1]
    C = w_fc.shape[0]
    C_pad = ((C + 127) // 128) * 128                 # lane-dense output width
    D_pad = ((D + 127) // 128) * 128                 # lane-dense projection K

    # Time-major & flattened so the kernel's hoisted projection is one matmul;
    # zero-pad D so the K dimension is lane-aligned; bf16 matmul operands.
    x_flat = jnp.transpose(x, (1, 0, 2)).reshape(T * B, D)
    x_pad = (jnp.zeros((T * B, D_pad), jnp.float32)
             .at[:, :D].set(x_flat).astype(jnp.bfloat16))

    # Pre-transpose weights so the kernel does plain (M,K) @ (K,N) matmuls;
    # fold the two LSTM biases together; zero-pad the FC to 128 lanes.
    wih_pad = (jnp.zeros((D_pad, 4 * H), jnp.float32)
               .at[:D, :].set(jnp.transpose(w_ih)).astype(jnp.bfloat16))
    whh_bf = jnp.transpose(w_hh).astype(jnp.bfloat16)          # (H, 4H) bf16
    b = (b_ih + b_hh).reshape(1, 4 * H)                        # (1, 4H) f32
    wfc_pad = (jnp.zeros((H, C_pad), jnp.float32)
               .at[:, :C].set(jnp.transpose(w_fc)))
    bfc_pad = (jnp.zeros((1, C_pad), jnp.float32)
               .at[:, :C].set(b_fc.reshape(1, C)))

    vmem = pl.BlockSpec(memory_space=pltpu.MemorySpace.VMEM)
    out_pad = pl.pallas_call(
        _lstm_fc_kernel,
        out_shape=jax.ShapeDtypeStruct((B, C_pad), jnp.float32),
        in_specs=[vmem] * 6,
        out_specs=vmem,
        scratch_shapes=[pltpu.VMEM((T * B, 4 * H), jnp.float32)],
        compiler_params=pltpu.CompilerParams(
            vmem_limit_bytes=32 * 1024 * 1024),
    )(x_pad, wih_pad, whh_bf, b, wfc_pad, bfc_pad)

    return out_pad[:, :C]


def _reference_forward(x, w_ih, w_hh, b_ih, b_hh, w_fc, b_fc):
    """Pure-JAX f32 reference matching PyTorch nn.LSTM + nn.Linear semantics."""
    x = jnp.squeeze(x, axis=1)            # (B, T, D)
    B, T, D = x.shape
    H = w_hh.shape[1]

    def step(carry, x_t):
        h, c = carry
        gates = x_t @ w_ih.T + b_ih + h @ w_hh.T + b_hh
        i_g = jax.nn.sigmoid(gates[:, 0 * H:1 * H])
        f_g = jax.nn.sigmoid(gates[:, 1 * H:2 * H])
        g_g = jnp.tanh(gates[:, 2 * H:3 * H])
        o_g = jax.nn.sigmoid(gates[:, 3 * H:4 * H])
        c = f_g * c + i_g * g_g
        h = o_g * jnp.tanh(c)
        return (h, c), None

    h0 = jnp.zeros((B, H), jnp.float32)
    c0 = jnp.zeros((B, H), jnp.float32)
    (h_T, _), _ = jax.lax.scan(step, (h0, c0), jnp.transpose(x, (1, 0, 2)))
    return h_T @ w_fc.T + b_fc


if __name__ == "__main__":
    # Module defaults: input_size=64, hidden_size=128, num_classes=40.
    B, T, D, H, C = 2, 8, 64, 128, 40

    key = jax.random.PRNGKey(0)
    ks = jax.random.split(key, 8)
    scale = 1.0 / jnp.sqrt(jnp.float32(H))   # PyTorch-style uniform init range

    x = jax.random.normal(ks[0], (B, 1, T, D), dtype=jnp.float32)
    w_ih = jax.random.uniform(ks[1], (4 * H, D), jnp.float32, -scale, scale)
    w_hh = jax.random.uniform(ks[2], (4 * H, H), jnp.float32, -scale, scale)
    b_ih = jax.random.uniform(ks[3], (4 * H,), jnp.float32, -scale, scale)
    b_hh = jax.random.uniform(ks[4], (4 * H,), jnp.float32, -scale, scale)
    w_fc = jax.random.uniform(ks[5], (C, H), jnp.float32, -scale, scale)
    b_fc = jax.random.uniform(ks[6], (C,), jnp.float32, -scale, scale)

    out = face_lstm_forward(x, w_ih, w_hh, b_ih, b_hh, w_fc, b_fc)
    out = jax.block_until_ready(out)

    ref = _reference_forward(x, w_ih, w_hh, b_ih, b_hh, w_fc, b_fc)
    assert out.shape == (B, C)
    # bf16 matmul operands (f32 accumulation) -> loosened tolerance vs the
    # pure-f32 reference, per the review's correctness note.
    assert jnp.allclose(out, ref, rtol=2e-2, atol=2e-2), "mismatch vs reference"

    print("KERNEL_OK")
</pallas_src>

<mosaic_0001>
module attributes {stable_mosaic.version = 11 : i64} {
  func.func @_lstm_fc_kernel(%arg0: memref<16x128xbf16, #tpu.memory_space<vmem>>, %arg1: memref<128x512xbf16, #tpu.memory_space<vmem>>, %arg2: memref<128x512xbf16, #tpu.memory_space<vmem>>, %arg3: memref<1x512xf32, #tpu.memory_space<vmem>>, %arg4: memref<128x128xf32, #tpu.memory_space<vmem>>, %arg5: memref<1x128xf32, #tpu.memory_space<vmem>>, %arg6: memref<2x128xf32, #tpu.memory_space<vmem>>, %arg7: memref<16x512xf32, #tpu.memory_space<vmem>>) attributes {dimension_semantics = [], scalar_prefetch = 0 : i64, scratch_operands = 1 : i64, tpu.core_type = #tpu.core_type<tc>} {
    %c0 = arith.constant 0 : index
    %c0_0 = arith.constant 0 : index
    %0 = vector.load %arg0[%c0, %c0_0] : memref<16x128xbf16, #tpu.memory_space<vmem>>, vector<16x128xbf16>
    %c0_1 = arith.constant 0 : index
    %c0_2 = arith.constant 0 : index
    %1 = vector.load %arg1[%c0_1, %c0_2] : memref<128x512xbf16, #tpu.memory_space<vmem>>, vector<128x512xbf16>
    %cst = arith.constant dense<0.000000e+00> : vector<16x512xf32>
    %2 = tpu.matmul %0, %1, %cst {dimension_numbers = #tpu.dot_dimension_numbers<[1], [0], [0], [1], [0, 0, 1, 1], [], []>} : vector<16x128xbf16>, vector<128x512xbf16>, vector<16x512xf32> -> vector<16x512xf32>
    %c0_3 = arith.constant 0 : index
    %c0_4 = arith.constant 0 : index
    %3 = vector.load %arg3[%c0_3, %c0_4] : memref<1x512xf32, #tpu.memory_space<vmem>>, vector<1x512xf32>
    %4 = vector.broadcast %3 : vector<1x512xf32> to vector<16x512xf32>
    %5 = arith.addf %2, %4 : vector<16x512xf32>
    %c0_5 = arith.constant 0 : index
    %c0_6 = arith.constant 0 : index
    %6 = vector.load %arg7[%c0_5, %c0_6] : memref<16x512xf32, #tpu.memory_space<vmem>>, vector<16x512xf32>
    tpu.vector_store %arg7[%c0_5, %c0_6], %5 {strides = array<i32>} : memref<16x512xf32, #tpu.memory_space<vmem>>, vector<16x512xf32>,
    %c0_7 = arith.constant 0 : index
    %c0_8 = arith.constant 0 : index
    %7 = vector.load %arg7[%c0_7, %c0_8] : memref<16x512xf32, #tpu.memory_space<vmem>>, vector<2x512xf32>
    %8 = vector.extract_strided_slice %7 {offsets = [0, 0], sizes = [2, 128], strides = [1, 1]} : vector<2x512xf32> to vector<2x128xf32>
    %cst_9 = arith.constant 5.000000e-01 : f32
    %9 = vector.broadcast %cst_9 : f32 to vector<2x128xf32>
    %10 = arith.mulf %9, %8 : vector<2x128xf32>
    %11 = math.tanh %10 : vector<2x128xf32>
    %cst_10 = arith.constant 1.000000e+00 : f32
    %12 = vector.broadcast %cst_10 : f32 to vector<2x128xf32>
    %13 = arith.addf %11, %12 : vector<2x128xf32>
    %cst_11 = arith.constant 5.000000e-01 : f32
    %14 = vector.broadcast %cst_11 : f32 to vector<2x128xf32>
    %15 = arith.mulf %14, %13 : vector<2x128xf32>
    %16 = vector.extract_strided_slice %7 {offsets = [0, 256], sizes = [2, 128], strides = [1, 1]} : vector<2x512xf32> to vector<2x128xf32>
    %17 = math.tanh %16 : vector<2x128xf32>
    %18 = vector.extract_strided_slice %7 {offsets = [0, 384], sizes = [2, 128], strides = [1, 1]} : vector<2x512xf32> to vector<2x128xf32>
    %cst_12 = arith.constant 5.000000e-01 : f32
    %19 = vector.broadcast %cst_12 : f32 to vector<2x128xf32>
    %20 = arith.mulf %19, %18 : vector<2x128xf32>
    %21 = math.tanh %20 : vector<2x128xf32>
    %cst_13 = arith.constant 1.000000e+00 : f32
    %22 = vector.broadcast %cst_13 : f32 to vector<2x128xf32>
    %23 = arith.addf %21, %22 : vector<2x128xf32>
    %cst_14 = arith.constant 5.000000e-01 : f32
    %24 = vector.broadcast %cst_14 : f32 to vector<2x128xf32>
    %25 = arith.mulf %24, %23 : vector<2x128xf32>
    %26 = arith.mulf %15, %17 : vector<2x128xf32>
    %27 = math.tanh %26 : vector<2x128xf32>
    %28 = arith.mulf %25, %27 : vector<2x128xf32>
    %c1_i32 = arith.constant 1 : i32
    %c2_i32 = arith.constant 2 : i32
    %29 = arith.muli %c1_i32, %c2_i32 : i32
    %30 = arith.index_cast %29 : i32 to index
    %c0_15 = arith.constant 0 : index
    %31 = vector.load %arg7[%30, %c0_15] : memref<16x512xf32, #tpu.memory_space<vmem>>, vector<2x512xf32>
    %32 = arith.truncf %28 : vector<2x128xf32> to vector<2x128xbf16>
    %c0_16 = arith.constant 0 : index
    %c0_17 = arith.constant 0 : index
    %33 = vector.load %arg2[%c0_16, %c0_17] : memref<128x512xbf16, #tpu.memory_space<vmem>>, vector<128x512xbf16>
    %cst_18 = arith.constant dense<0.000000e+00> : vector<2x512xf32>
    %34 = tpu.matmul %32, %33, %cst_18 {dimension_numbers = #tpu.dot_dimension_numbers<[1], [0], [0], [1], [0, 0, 1, 1], [], []>} : vector<2x128xbf16>, vector<128x512xbf16>, vector<2x512xf32> -> vector<2x512xf32>
    %35 = arith.addf %31, %34 : vector<2x512xf32>
    %36 = vector.extract_strided_slice %35 {offsets = [0, 0], sizes = [2, 128], strides = [1, 1]} : vector<2x512xf32> to vector<2x128xf32>
    %cst_19 = arith.constant 5.000000e-01 : f32
    %37 = vector.broadcast %cst_19 : f32 to vector<2x128xf32>
    %38 = arith.mulf %37, %36 : vector<2x128xf32>
    %39 = math.tanh %38 : vector<2x128xf32>
    %cst_20 = arith.constant 1.000000e+00 : f32
    %40 = vector.broadcast %cst_20 : f32 to vector<2x128xf32>
    %41 = arith.addf %39, %40 : vector<2x128xf32>
    %cst_21 = arith.constant 5.000000e-01 : f32
    %42 = vector.broadcast %cst_21 : f32 to vector<2x128xf32>
    %43 = arith.mulf %42, %41 : vector<2x128xf32>
    %44 = vector.extract_strided_slice %35 {offsets = [0, 128], sizes = [2, 128], strides = [1, 1]} : vector<2x512xf32> to vector<2x128xf32>
    %cst_22 = arith.constant 5.000000e-01 : f32
    %45 = vector.broadcast %cst_22 : f32 to vector<2x128xf32>
    %46 = arith.mulf %45, %44 : vector<2x128xf32>
    %47 = math.tanh %46 : vector<2x128xf32>
    %cst_23 = arith.constant 1.000000e+00 : f32
    %48 = vector.broadcast %cst_23 : f32 to vector<2x128xf32>
    %49 = arith.addf %47, %48 : vector<2x128xf32>
    %cst_24 = arith.constant 5.000000e-01 : f32
    %50 = vector.broadcast %cst_24 : f32 to vector<2x128xf32>
    %51 = arith.mulf %50, %49 : vector<2x128xf32>
    %52 = vector.extract_strided_slice %35 {offsets = [0, 256], sizes = [2, 128], strides = [1, 1]} : vector<2x512xf32> to vector<2x128xf32>
    %53 = math.tanh %52 : vector<2x128xf32>
    %54 = vector.extract_strided_slice %35 {offsets = [0, 384], sizes = [2, 128], strides = [1, 1]} : vector<2x512xf32> to vector<2x128xf32>
    %cst_25 = arith.constant 5.000000e-01 : f32
    %55 = vector.broadcast %cst_25 : f32 to vector<2x128xf32>
    %56 = arith.mulf %55, %54 : vector<2x128xf32>
    %57 = math.tanh %56 : vector<2x128xf32>
    %cst_26 = arith.constant 1.000000e+00 : f32
    %58 = vector.broadcast %cst_26 : f32 to vector<2x128xf32>
    %59 = arith.addf %57, %58 : vector<2x128xf32>
    %cst_27 = arith.constant 5.000000e-01 : f32
    %60 = vector.broadcast %cst_27 : f32 to vector<2x128xf32>
    %61 = arith.mulf %60, %59 : vector<2x128xf32>
    %62 = arith.mulf %51, %26 : vector<2x128xf32>
    %63 = arith.mulf %43, %53 : vector<2x128xf32>
    %64 = arith.addf %62, %63 : vector<2x128xf32>
    %65 = math.tanh %64 : vector<2x128xf32>
    %66 = arith.mulf %61, %65 : vector<2x128xf32>
    %c2_i32_28 = arith.constant 2 : i32
    %c2_i32_29 = arith.constant 2 : i32
    %67 = arith.muli %c2_i32_28, %c2_i32_29 : i32
    %68 = arith.index_cast %67 : i32 to index
    %c0_30 = arith.constant 0 : index
    %69 = vector.load %arg7[%68, %c0_30] : memref<16x512xf32, #tpu.memory_space<vmem>>, vector<2x512xf32>
    %70 = arith.truncf %66 : vector<2x128xf32> to vector<2x128xbf16>
    %c0_31 = arith.constant 0 : index
    %c0_32 = arith.constant 0 : index
    %71 = vector.load %arg2[%c0_31, %c0_32] : memref<128x512xbf16, #tpu.memory_space<vmem>>, vector<128x512xbf16>
    %cst_33 = arith.constant dense<0.000000e+00> : vector<2x512xf32>
    %72 = tpu.matmul %70, %71, %cst_33 {dimension_numbers = #tpu.dot_dimension_numbers<[1], [0], [0], [1], [0, 0, 1, 1], [], []>} : vector<2x128xbf16>, vector<128x512xbf16>, vector<2x512xf32> -> vector<2x512xf32>
    %73 = arith.addf %69, %72 : vector<2x512xf32>
    %74 = vector.extract_strided_slice %73 {offsets = [0, 0], sizes = [2, 128], strides = [1, 1]} : vector<2x512xf32> to vector<2x128xf32>
    %cst_34 = arith.constant 5.000000e-01 : f32
    %75 = vector.broadcast %cst_34 : f32 to vector<2x128xf32>
    %76 = arith.mulf %75, %74 : vector<2x128xf32>
    %77 = math.tanh %76 : vector<2x128xf32>
    %cst_35 = arith.constant 1.000000e+00 : f32
    %78 = vector.broadcast %cst_35 : f32 to vector<2x128xf32>
    %79 = arith.addf %77, %78 : vector<2x128xf32>
    %cst_36 = arith.constant 5.000000e-01 : f32
    %80 = vector.broadcast %cst_36 : f32 to vector<2x128xf32>
    %81 = arith.mulf %80, %79 : vector<2x128xf32>
    %82 = vector.extract_strided_slice %73 {offsets = [0, 128], sizes = [2, 128], strides = [1, 1]} : vector<2x512xf32> to vector<2x128xf32>
    %cst_37 = arith.constant 5.000000e-01 : f32
    %83 = vector.broadcast %cst_37 : f32 to vector<2x128xf32>
    %84 = arith.mulf %83, %82 : vector<2x128xf32>
    %85 = math.tanh %84 : vector<2x128xf32>
    %cst_38 = arith.constant 1.000000e+00 : f32
    %86 = vector.broadcast %cst_38 : f32 to vector<2x128xf32>
    %87 = arith.addf %85, %86 : vector<2x128xf32>
    %cst_39 = arith.constant 5.000000e-01 : f32
    %88 = vector.broadcast %cst_39 : f32 to vector<2x128xf32>
    %89 = arith.mulf %88, %87 : vector<2x128xf32>
    %90 = vector.extract_strided_slice %73 {offsets = [0, 256], sizes = [2, 128], strides = [1, 1]} : vector<2x512xf32> to vector<2x128xf32>
    %91 = math.tanh %90 : vector<2x128xf32>
    %92 = vector.extract_strided_slice %73 {offsets = [0, 384], sizes = [2, 128], strides = [1, 1]} : vector<2x512xf32> to vector<2x128xf32>
    %cst_40 = arith.constant 5.000000e-01 : f32
    %93 = vector.broadcast %cst_40 : f32 to vector<2x128xf32>
    %94 = arith.mulf %93, %92 : vector<2x128xf32>
    %95 = math.tanh %94 : vector<2x128xf32>
    %cst_41 = arith.constant 1.000000e+00 : f32
    %96 = vector.broadcast %cst_41 : f32 to vector<2x128xf32>
    %97 = arith.addf %95, %96 : vector<2x128xf32>
    %cst_42 = arith.constant 5.000000e-01 : f32
    %98 = vector.broadcast %cst_42 : f32 to vector<2x128xf32>
    %99 = arith.mulf %98, %97 : vector<2x128xf32>
    %100 = arith.mulf %89, %64 : vector<2x128xf32>
    %101 = arith.mulf %81, %91 : vector<2x128xf32>
    %102 = arith.addf %100, %101 : vector<2x128xf32>
    %103 = math.tanh %102 : vector<2x128xf32>
    %104 = arith.mulf %99, %103 : vector<2x128xf32>
    %c3_i32 = arith.constant 3 : i32
    %c2_i32_43 = arith.constant 2 : i32
    %105 = arith.muli %c3_i32, %c2_i32_43 : i32
    %106 = arith.index_cast %105 : i32 to index
    %c0_44 = arith.constant 0 : index
    %107 = vector.load %arg7[%106, %c0_44] : memref<16x512xf32, #tpu.memory_space<vmem>>, vector<2x512xf32>
    %108 = arith.truncf %104 : vector<2x128xf32> to vector<2x128xbf16>
    %c0_45 = arith.constant 0 : index
    %c0_46 = arith.constant 0 : index
    %109 = vector.load %arg2[%c0_45, %c0_46] : memref<128x512xbf16, #tpu.memory_space<vmem>>, vector<128x512xbf16>
    %cst_47 = arith.constant dense<0.000000e+00> : vector<2x512xf32>
    %110 = tpu.matmul %108, %109, %cst_47 {dimension_numbers = #tpu.dot_dimension_numbers<[1], [0], [0], [1], [0, 0, 1, 1], [], []>} : vector<2x128xbf16>, vector<128x512xbf16>, vector<2x512xf32> -> vector<2x512xf32>
    %111 = arith.addf %107, %110 : vector<2x512xf32>
    %112 = vector.extract_strided_slice %111 {offsets = [0, 0], sizes = [2, 128], strides = [1, 1]} : vector<2x512xf32> to vector<2x128xf32>
    %cst_48 = arith.constant 5.000000e-01 : f32
    %113 = vector.broadcast %cst_48 : f32 to vector<2x128xf32>
    %114 = arith.mulf %113, %112 : vector<2x128xf32>
    %115 = math.tanh %114 : vector<2x128xf32>
    %cst_49 = arith.constant 1.000000e+00 : f32
    %116 = vector.broadcast %cst_49 : f32 to vector<2x128xf32>
    %117 = arith.addf %115, %116 : vector<2x128xf32>
    %cst_50 = arith.constant 5.000000e-01 : f32
    %118 = vector.broadcast %cst_50 : f32 to vector<2x128xf32>
    %119 = arith.mulf %118, %117 : vector<2x128xf32>
    %120 = vector.extract_strided_slice %111 {offsets = [0, 128], sizes = [2, 128], strides = [1, 1]} : vector<2x512xf32> to vector<2x128xf32>
    %cst_51 = arith.constant 5.000000e-01 : f32
    %121 = vector.broadcast %cst_51 : f32 to vector<2x128xf32>
    %122 = arith.mulf %121, %120 : vector<2x128xf32>
    %123 = math.tanh %122 : vector<2x128xf32>
    %cst_52 = arith.constant 1.000000e+00 : f32
    %124 = vector.broadcast %cst_52 : f32 to vector<2x128xf32>
    %125 = arith.addf %123, %124 : vector<2x128xf32>
    %cst_53 = arith.constant 5.000000e-01 : f32
    %126 = vector.broadcast %cst_53 : f32 to vector<2x128xf32>
    %127 = arith.mulf %126, %125 : vector<2x128xf32>
    %128 = vector.extract_strided_slice %111 {offsets = [0, 256], sizes = [2, 128], strides = [1, 1]} : vector<2x512xf32> to vector<2x128xf32>
    %129 = math.tanh %128 : vector<2x128xf32>
    %130 = vector.extract_strided_slice %111 {offsets = [0, 384], sizes = [2, 128], strides = [1, 1]} : vector<2x512xf32> to vector<2x128xf32>
    %cst_54 = arith.constant 5.000000e-01 : f32
    %131 = vector.broadcast %cst_54 : f32 to vector<2x128xf32>
    %132 = arith.mulf %131, %130 : vector<2x128xf32>
    %133 = math.tanh %132 : vector<2x128xf32>
    %cst_55 = arith.constant 1.000000e+00 : f32
    %134 = vector.broadcast %cst_55 : f32 to vector<2x128xf32>
    %135 = arith.addf %133, %134 : vector<2x128xf32>
    %cst_56 = arith.constant 5.000000e-01 : f32
    %136 = vector.broadcast %cst_56 : f32 to vector<2x128xf32>
    %137 = arith.mulf %136, %135 : vector<2x128xf32>
    %138 = arith.mulf %127, %102 : vector<2x128xf32>
    %139 = arith.mulf %119, %129 : vector<2x128xf32>
    %140 = arith.addf %138, %139 : vector<2x128xf32>
    %141 = math.tanh %140 : vector<2x128xf32>
    %142 = arith.mulf %137, %141 : vector<2x128xf32>
    %c4_i32 = arith.constant 4 : i32
    %c2_i32_57 = arith.constant 2 : i32
    %143 = arith.muli %c4_i32, %c2_i32_57 : i32
    %144 = arith.index_cast %143 : i32 to index
    %c0_58 = arith.constant 0 : index
    %145 = vector.load %arg7[%144, %c0_58] : memref<16x512xf32, #tpu.memory_space<vmem>>, vector<2x512xf32>
    %146 = arith.truncf %142 : vector<2x128xf32> to vector<2x128xbf16>
    %c0_59 = arith.constant 0 : index
    %c0_60 = arith.constant 0 : index
    %147 = vector.load %arg2[%c0_59, %c0_60] : memref<128x512xbf16, #tpu.memory_space<vmem>>, vector<128x512xbf16>
    %cst_61 = arith.constant dense<0.000000e+00> : vector<2x512xf32>
    %148 = tpu.matmul %146, %147, %cst_61 {dimension_numbers = #tpu.dot_dimension_numbers<[1], [0], [0], [1], [0, 0, 1, 1], [], []>} : vector<2x128xbf16>, vector<128x512xbf16>, vector<2x512xf32> -> vector<2x512xf32>
    %149 = arith.addf %145, %148 : vector<2x512xf32>
    %150 = vector.extract_strided_slice %149 {offsets = [0, 0], sizes = [2, 128], strides = [1, 1]} : vector<2x512xf32> to vector<2x128xf32>
    %cst_62 = arith.constant 5.000000e-01 : f32
    %151 = vector.broadcast %cst_62 : f32 to vector<2x128xf32>
    %152 = arith.mulf %151, %150 : vector<2x128xf32>
    %153 = math.tanh %152 : vector<2x128xf32>
    %cst_63 = arith.constant 1.000000e+00 : f32
    %154 = vector.broadcast %cst_63 : f32 to vector<2x128xf32>
    %155 = arith.addf %153, %154 : vector<2x128xf32>
    %cst_64 = arith.constant 5.000000e-01 : f32
    %156 = vector.broadcast %cst_64 : f32 to vector<2x128xf32>
    %157 = arith.mulf %156, %155 : vector<2x128xf32>
    %158 = vector.extract_strided_slice %149 {offsets = [0, 128], sizes = [2, 128], strides = [1, 1]} : vector<2x512xf32> to vector<2x128xf32>
    %cst_65 = arith.constant 5.000000e-01 : f32
    %159 = vector.broadcast %cst_65 : f32 to vector<2x128xf32>
    %160 = arith.mulf %159, %158 : vector<2x128xf32>
    %161 = math.tanh %160 : vector<2x128xf32>
    %cst_66 = arith.constant 1.000000e+00 : f32
    %162 = vector.broadcast %cst_66 : f32 to vector<2x128xf32>
    %163 = arith.addf %161, %162 : vector<2x128xf32>
    %cst_67 = arith.constant 5.000000e-01 : f32
    %164 = vector.broadcast %cst_67 : f32 to vector<2x128xf32>
    %165 = arith.mulf %164, %163 : vector<2x128xf32>
    %166 = vector.extract_strided_slice %149 {offsets = [0, 256], sizes = [2, 128], strides = [1, 1]} : vector<2x512xf32> to vector<2x128xf32>
    %167 = math.tanh %166 : vector<2x128xf32>
    %168 = vector.extract_strided_slice %149 {offsets = [0, 384], sizes = [2, 128], strides = [1, 1]} : vector<2x512xf32> to vector<2x128xf32>
    %cst_68 = arith.constant 5.000000e-01 : f32
    %169 = vector.broadcast %cst_68 : f32 to vector<2x128xf32>
    %170 = arith.mulf %169, %168 : vector<2x128xf32>
    %171 = math.tanh %170 : vector<2x128xf32>
    %cst_69 = arith.constant 1.000000e+00 : f32
    %172 = vector.broadcast %cst_69 : f32 to vector<2x128xf32>
    %173 = arith.addf %171, %172 : vector<2x128xf32>
    %cst_70 = arith.constant 5.000000e-01 : f32
    %174 = vector.broadcast %cst_70 : f32 to vector<2x128xf32>
    %175 = arith.mulf %174, %173 : vector<2x128xf32>
    %176 = arith.mulf %165, %140 : vector<2x128xf32>
    %177 = arith.mulf %157, %167 : vector<2x128xf32>
    %178 = arith.addf %176, %177 : vector<2x128xf32>
    %179 = math.tanh %178 : vector<2x128xf32>
    %180 = arith.mulf %175, %179 : vector<2x128xf32>
    %c5_i32 = arith.constant 5 : i32
    %c2_i32_71 = arith.constant 2 : i32
    %181 = arith.muli %c5_i32, %c2_i32_71 : i32
    %182 = arith.index_cast %181 : i32 to index
    %c0_72 = arith.constant 0 : index
    %183 = vector.load %arg7[%182, %c0_72] : memref<16x512xf32, #tpu.memory_space<vmem>>, vector<2x512xf32>
    %184 = arith.truncf %180 : vector<2x128xf32> to vector<2x128xbf16>
    %c0_73 = arith.constant 0 : index
    %c0_74 = arith.constant 0 : index
    %185 = vector.load %arg2[%c0_73, %c0_74] : memref<128x512xbf16, #tpu.memory_space<vmem>>, vector<128x512xbf16>
    %cst_75 = arith.constant dense<0.000000e+00> : vector<2x512xf32>
    %186 = tpu.matmul %184, %185, %cst_75 {dimension_numbers = #tpu.dot_dimension_numbers<[1], [0], [0], [1], [0, 0, 1, 1], [], []>} : vector<2x128xbf16>, vector<128x512xbf16>, vector<2x512xf32> -> vector<2x512xf32>
    %187 = arith.addf %183, %186 : vector<2x512xf32>
    %188 = vector.extract_strided_slice %187 {offsets = [0, 0], sizes = [2, 128], strides = [1, 1]} : vector<2x512xf32> to vector<2x128xf32>
    %cst_76 = arith.constant 5.000000e-01 : f32
    %189 = vector.broadcast %cst_76 : f32 to vector<2x128xf32>
    %190 = arith.mulf %189, %188 : vector<2x128xf32>
    %191 = math.tanh %190 : vector<2x128xf32>
    %cst_77 = arith.constant 1.000000e+00 : f32
    %192 = vector.broadcast %cst_77 : f32 to vector<2x128xf32>
    %193 = arith.addf %191, %192 : vector<2x128xf32>
    %cst_78 = arith.constant 5.000000e-01 : f32
    %194 = vector.broadcast %cst_78 : f32 to vector<2x128xf32>
    %195 = arith.mulf %194, %193 : vector<2x128xf32>
    %196 = vector.extract_strided_slice %187 {offsets = [0, 128], sizes = [2, 128], strides = [1, 1]} : vector<2x512xf32> to vector<2x128xf32>
    %cst_79 = arith.constant 5.000000e-01 : f32
    %197 = vector.broadcast %cst_79 : f32 to vector<2x128xf32>
    %198 = arith.mulf %197, %196 : vector<2x128xf32>
    %199 = math.tanh %198 : vector<2x128xf32>
    %cst_80 = arith.constant 1.000000e+00 : f32
    %200 = vector.broadcast %cst_80 : f32 to vector<2x128xf32>
    %201 = arith.addf %199, %200 : vector<2x128xf32>
    %cst_81 = arith.constant 5.000000e-01 : f32
    %202 = vector.broadcast %cst_81 : f32 to vector<2x128xf32>
    %203 = arith.mulf %202, %201 : vector<2x128xf32>
    %204 = vector.extract_strided_slice %187 {offsets = [0, 256], sizes = [2, 128], strides = [1, 1]} : vector<2x512xf32> to vector<2x128xf32>
    %205 = math.tanh %204 : vector<2x128xf32>
    %206 = vector.extract_strided_slice %187 {offsets = [0, 384], sizes = [2, 128], strides = [1, 1]} : vector<2x512xf32> to vector<2x128xf32>
    %cst_82 = arith.constant 5.000000e-01 : f32
    %207 = vector.broadcast %cst_82 : f32 to vector<2x128xf32>
    %208 = arith.mulf %207, %206 : vector<2x128xf32>
    %209 = math.tanh %208 : vector<2x128xf32>
    %cst_83 = arith.constant 1.000000e+00 : f32
    %210 = vector.broadcast %cst_83 : f32 to vector<2x128xf32>
    %211 = arith.addf %209, %210 : vector<2x128xf32>
    %cst_84 = arith.constant 5.000000e-01 : f32
    %212 = vector.broadcast %cst_84 : f32 to vector<2x128xf32>
    %213 = arith.mulf %212, %211 : vector<2x128xf32>
    %214 = arith.mulf %203, %178 : vector<2x128xf32>
    %215 = arith.mulf %195, %205 : vector<2x128xf32>
    %216 = arith.addf %214, %215 : vector<2x128xf32>
    %217 = math.tanh %216 : vector<2x128xf32>
    %218 = arith.mulf %213, %217 : vector<2x128xf32>
    %c6_i32 = arith.constant 6 : i32
    %c2_i32_85 = arith.constant 2 : i32
    %219 = arith.muli %c6_i32, %c2_i32_85 : i32
    %220 = arith.index_cast %219 : i32 to index
    %c0_86 = arith.constant 0 : index
    %221 = vector.load %arg7[%220, %c0_86] : memref<16x512xf32, #tpu.memory_space<vmem>>, vector<2x512xf32>
    %222 = arith.truncf %218 : vector<2x128xf32> to vector<2x128xbf16>
    %c0_87 = arith.constant 0 : index
    %c0_88 = arith.constant 0 : index
    %223 = vector.load %arg2[%c0_87, %c0_88] : memref<128x512xbf16, #tpu.memory_space<vmem>>, vector<128x512xbf16>
    %cst_89 = arith.constant dense<0.000000e+00> : vector<2x512xf32>
    %224 = tpu.matmul %222, %223, %cst_89 {dimension_numbers = #tpu.dot_dimension_numbers<[1], [0], [0], [1], [0, 0, 1, 1], [], []>} : vector<2x128xbf16>, vector<128x512xbf16>, vector<2x512xf32> -> vector<2x512xf32>
    %225 = arith.addf %221, %224 : vector<2x512xf32>
    %226 = vector.extract_strided_slice %225 {offsets = [0, 0], sizes = [2, 128], strides = [1, 1]} : vector<2x512xf32> to vector<2x128xf32>
    %cst_90 = arith.constant 5.000000e-01 : f32
    %227 = vector.broadcast %cst_90 : f32 to vector<2x128xf32>
    %228 = arith.mulf %227, %226 : vector<2x128xf32>
    %229 = math.tanh %228 : vector<2x128xf32>
    %cst_91 = arith.constant 1.000000e+00 : f32
    %230 = vector.broadcast %cst_91 : f32 to vector<2x128xf32>
    %231 = arith.addf %229, %230 : vector<2x128xf32>
    %cst_92 = arith.constant 5.000000e-01 : f32
    %232 = vector.broadcast %cst_92 : f32 to vector<2x128xf32>
    %233 = arith.mulf %232, %231 : vector<2x128xf32>
    %234 = vector.extract_strided_slice %225 {offsets = [0, 128], sizes = [2, 128], strides = [1, 1]} : vector<2x512xf32> to vector<2x128xf32>
    %cst_93 = arith.constant 5.000000e-01 : f32
    %235 = vector.broadcast %cst_93 : f32 to vector<2x128xf32>
    %236 = arith.mulf %235, %234 : vector<2x128xf32>
    %237 = math.tanh %236 : vector<2x128xf32>
    %cst_94 = arith.constant 1.000000e+00 : f32
    %238 = vector.broadcast %cst_94 : f32 to vector<2x128xf32>
    %239 = arith.addf %237, %238 : vector<2x128xf32>
    %cst_95 = arith.constant 5.000000e-01 : f32
    %240 = vector.broadcast %cst_95 : f32 to vector<2x128xf32>
    %241 = arith.mulf %240, %239 : vector<2x128xf32>
    %242 = vector.extract_strided_slice %225 {offsets = [0, 256], sizes = [2, 128], strides = [1, 1]} : vector<2x512xf32> to vector<2x128xf32>
    %243 = math.tanh %242 : vector<2x128xf32>
    %244 = vector.extract_strided_slice %225 {offsets = [0, 384], sizes = [2, 128], strides = [1, 1]} : vector<2x512xf32> to vector<2x128xf32>
    %cst_96 = arith.constant 5.000000e-01 : f32
    %245 = vector.broadcast %cst_96 : f32 to vector<2x128xf32>
    %246 = arith.mulf %245, %244 : vector<2x128xf32>
    %247 = math.tanh %246 : vector<2x128xf32>
    %cst_97 = arith.constant 1.000000e+00 : f32
    %248 = vector.broadcast %cst_97 : f32 to vector<2x128xf32>
    %249 = arith.addf %247, %248 : vector<2x128xf32>
    %cst_98 = arith.constant 5.000000e-01 : f32
    %250 = vector.broadcast %cst_98 : f32 to vector<2x128xf32>
    %251 = arith.mulf %250, %249 : vector<2x128xf32>
    %252 = arith.mulf %241, %216 : vector<2x128xf32>
    %253 = arith.mulf %233, %243 : vector<2x128xf32>
    %254 = arith.addf %252, %253 : vector<2x128xf32>
    %255 = math.tanh %254 : vector<2x128xf32>
    %256 = arith.mulf %251, %255 : vector<2x128xf32>
    %c7_i32 = arith.constant 7 : i32
    %c2_i32_99 = arith.constant 2 : i32
    %257 = arith.muli %c7_i32, %c2_i32_99 : i32
    %258 = arith.index_cast %257 : i32 to index
    %c0_100 = arith.constant 0 : index
    %259 = vector.load %arg7[%258, %c0_100] : memref<16x512xf32, #tpu.memory_space<vmem>>, vector<2x512xf32>
    %260 = arith.truncf %256 : vector<2x128xf32> to vector<2x128xbf16>
    %c0_101 = arith.constant 0 : index
    %c0_102 = arith.constant 0 : index
    %261 = vector.load %arg2[%c0_101, %c0_102] : memref<128x512xbf16, #tpu.memory_space<vmem>>, vector<128x512xbf16>
    %cst_103 = arith.constant dense<0.000000e+00> : vector<2x512xf32>
    %262 = tpu.matmul %260, %261, %cst_103 {dimension_numbers = #tpu.dot_dimension_numbers<[1], [0], [0], [1], [0, 0, 1, 1], [], []>} : vector<2x128xbf16>, vector<128x512xbf16>, vector<2x512xf32> -> vector<2x512xf32>
    %263 = arith.addf %259, %262 : vector<2x512xf32>
    %264 = vector.extract_strided_slice %263 {offsets = [0, 0], sizes = [2, 128], strides = [1, 1]} : vector<2x512xf32> to vector<2x128xf32>
    %cst_104 = arith.constant 5.000000e-01 : f32
    %265 = vector.broadcast %cst_104 : f32 to vector<2x128xf32>
    %266 = arith.mulf %265, %264 : vector<2x128xf32>
    %267 = math.tanh %266 : vector<2x128xf32>
    %cst_105 = arith.constant 1.000000e+00 : f32
    %268 = vector.broadcast %cst_105 : f32 to vector<2x128xf32>
    %269 = arith.addf %267, %268 : vector<2x128xf32>
    %cst_106 = arith.constant 5.000000e-01 : f32
    %270 = vector.broadcast %cst_106 : f32 to vector<2x128xf32>
    %271 = arith.mulf %270, %269 : vector<2x128xf32>
    %272 = vector.extract_strided_slice %263 {offsets = [0, 128], sizes = [2, 128], strides = [1, 1]} : vector<2x512xf32> to vector<2x128xf32>
    %cst_107 = arith.constant 5.000000e-01 : f32
    %273 = vector.broadcast %cst_107 : f32 to vector<2x128xf32>
    %274 = arith.mulf %273, %272 : vector<2x128xf32>
    %275 = math.tanh %274 : vector<2x128xf32>
    %cst_108 = arith.constant 1.000000e+00 : f32
    %276 = vector.broadcast %cst_108 : f32 to vector<2x128xf32>
    %277 = arith.addf %275, %276 : vector<2x128xf32>
    %cst_109 = arith.constant 5.000000e-01 : f32
    %278 = vector.broadcast %cst_109 : f32 to vector<2x128xf32>
    %279 = arith.mulf %278, %277 : vector<2x128xf32>
    %280 = vector.extract_strided_slice %263 {offsets = [0, 256], sizes = [2, 128], strides = [1, 1]} : vector<2x512xf32> to vector<2x128xf32>
    %281 = math.tanh %280 : vector<2x128xf32>
    %282 = vector.extract_strided_slice %263 {offsets = [0, 384], sizes = [2, 128], strides = [1, 1]} : vector<2x512xf32> to vector<2x128xf32>
    %cst_110 = arith.constant 5.000000e-01 : f32
    %283 = vector.broadcast %cst_110 : f32 to vector<2x128xf32>
    %284 = arith.mulf %283, %282 : vector<2x128xf32>
    %285 = math.tanh %284 : vector<2x128xf32>
    %cst_111 = arith.constant 1.000000e+00 : f32
    %286 = vector.broadcast %cst_111 : f32 to vector<2x128xf32>
    %287 = arith.addf %285, %286 : vector<2x128xf32>
    %cst_112 = arith.constant 5.000000e-01 : f32
    %288 = vector.broadcast %cst_112 : f32 to vector<2x128xf32>
    %289 = arith.mulf %288, %287 : vector<2x128xf32>
    %290 = arith.mulf %279, %254 : vector<2x128xf32>
    %291 = arith.mulf %271, %281 : vector<2x128xf32>
    %292 = arith.addf %290, %291 : vector<2x128xf32>
    %293 = math.tanh %292 : vector<2x128xf32>
    %294 = arith.mulf %289, %293 : vector<2x128xf32>
    %c7_i32_113 = arith.constant 7 : i32
    %c0_114 = arith.constant 0 : index
    %c0_115 = arith.constant 0 : index
    %295 = vector.load %arg4[%c0_114, %c0_115] : memref<128x128xf32, #tpu.memory_space<vmem>>, vector<128x128xf32>
    %cst_116 = arith.constant dense<0.000000e+00> : vector<2x128xf32>
    %296 = tpu.matmul %294, %295, %cst_116 {dimension_numbers = #tpu.dot_dimension_numbers<[1], [0], [0], [1], [0, 0, 1, 1], [], []>} : vector<2x128xf32>, vector<128x128xf32>, vector<2x128xf32> -> vector<2x128xf32>
    %c0_117 = arith.constant 0 : index
    %c0_118 = arith.constant 0 : index
    %297 = vector.load %arg5[%c0_117, %c0_118] : memref<1x128xf32, #tpu.memory_space<vmem>>, vector<1x128xf32>
    %298 = vector.broadcast %297 : vector<1x128xf32> to vector<2x128xf32>
    %299 = arith.addf %296, %298 : vector<2x128xf32>
    %c0_119 = arith.constant 0 : index
    %c0_120 = arith.constant 0 : index
    %300 = vector.load %arg6[%c0_119, %c0_120] : memref<2x128xf32, #tpu.memory_space<vmem>>, vector<2x128xf32>
    tpu.vector_store %arg6[%c0_119, %c0_120], %299 {strides = array<i32>} : memref<2x128xf32, #tpu.memory_space<vmem>>, vector<2x128xf32>,
    return
  }
}

</mosaic_0001>

<bundles_post_ra>
// kernel: face_lstm_forward.1
= control target key start
LH: loop header
LB: loop body
LE: loop exit
PB: predicated region body
PF: predicated region fallthrough
CT: control target
= control target key end

     0   :  { %v1894_v2 = vmov 0   ;;  %s2563_s0 = inlined_call_operand.vmem [shape: bf16[16,128], index: 0, kind: input, shape index: {}]   ;;  %s2564_s1 = inlined_call_operand.vmem [shape: bf16[128,512], index: 1, kind: input, shape index: {}]   ;;  %s2565_s2 = inlined_call_operand.vmem [shape: bf16[128,512], index: 2, kind: input, shape index: {}]   ;;  %s2566_s3 = inlined_call_operand.vmem [shape: f32[1,512], index: 3, kind: input, shape index: {}]   ;;  %s2567_s4 = inlined_call_operand.vmem [shape: f32[128,128], index: 4, kind: input, shape index: {}]   ;;  %s2568_s5 = inlined_call_operand.vmem [shape: f32[1,128], index: 5, kind: input, shape index: {}]   ;;  %s2569_s6 = inlined_call_operand.hbm [shape: f32[2,128], index: 6, kind: output, shape index: {}]  }
   0x1   :  { %v1677_v0 = vld [vmem:[%s2564_s1 + $0x4] ss:$16 sps:$4 sm:$0xff]   ;;  %v1679_v1 = vld [vmem:[%s2564_s1] ss:$16 sps:$4 sm:$0xff]   ;;  %279 = vmatprep.mubr.bf16.mxu0 %v1894_v2  ;;  %322 = vmatprep.mubr.bf16.mxu1 %v1894_v2  ;;  %v1680_v3 = vld [vmem:[%s2564_s1 + $0xc] ss:$16 sps:$4 sm:$0xff]  }
   0x2   :  { %247 = vmatprep.subr.bf16.mxu0 %v1677_v0  ;;  %v1682_v4 = vld [vmem:[%s2564_s1 + $0x24] ss:$16 sps:$4 sm:$0xff]   ;;  %v1684_v5 = vld [vmem:[%s2564_s1 + $0x8] ss:$16 sps:$4 sm:$0xff]   ;;  %v1685_v6 = vld [vmem:[%s2564_s1 + $0x20] ss:$16 sps:$4 sm:$0xff]   ;;  %290 = vmatprep.subr.bf16.mxu1 %v1680_v3 }
   0x3   :  { %248 = vmatpush1.bf16.msra.mxu0 %v1679_v1  ;;  %v1686_v7 = vld [vmem:[%s2564_s1 + $0x2c] ss:$16 sps:$4 sm:$0xff]   ;;  %291 = vmatpush1.bf16.msra.mxu1 %v1684_v5  ;;  %v1688_v8 = vld [vmem:[%s2564_s1 + $0x44] ss:$16 sps:$4 sm:$0xff]   ;;  %v1690_v9 = vld [vmem:[%s2564_s1 + $0x28] ss:$16 sps:$4 sm:$0xff]  }
   0x4   :  { %249 = vmatprep.subr.bf16.mxu0 %v1682_v4  ;;  %292 = vmatprep.subr.bf16.mxu1 %v1686_v7  ;;  %v1691_v10 = vld [vmem:[%s2564_s1 + $0x40] ss:$16 sps:$4 sm:$0xff]   ;;  %v1692_v11 = vld [vmem:[%s2564_s1 + $0x4c] ss:$16 sps:$4 sm:$0xff]   ;;  %v1694_v12 = vld [vmem:[%s2564_s1 + $0x64] ss:$16 sps:$4 sm:$0xff]  }
   0x5   :  { %v1696_v13 = vld [vmem:[%s2564_s1 + $0x48] ss:$16 sps:$4 sm:$0xff]   ;;  %v1698_v14 = vld [vmem:[%s2564_s1 + $0x6c] ss:$16 sps:$4 sm:$0xff]   ;;  %v1697_v15 = vld [vmem:[%s2564_s1 + $0x60] ss:$16 sps:$4 sm:$0xff]  }
   0x6   :  { %v1700_v16 = vld [vmem:[%s2564_s1 + $0x84] ss:$16 sps:$4 sm:$0xff]   ;;  %v1702_v17 = vld [vmem:[%s2564_s1 + $0x68] ss:$16 sps:$4 sm:$0xff]   ;;  %v1704_v18 = vld [vmem:[%s2564_s1 + $0x8c] ss:$16 sps:$4 sm:$0xff]  }
   0x7   :  { %250 = vmatpush1.bf16.msra.mxu0 %v1685_v6  ;;  %293 = vmatpush1.bf16.msra.mxu1 %v1690_v9  ;;  %v1703_v19 = vld [vmem:[%s2564_s1 + $0x80] ss:$16 sps:$4 sm:$0xff]   ;;  %v1706_v20 = vld [vmem:[%s2564_s1 + $0xa4] ss:$16 sps:$4 sm:$0xff]   ;;  %v1708_v21 = vld [vmem:[%s2564_s1 + $0x88] ss:$16 sps:$4 sm:$0xff]  }
   0x8   :  { %251 = vmatprep.subr.bf16.mxu0 %v1688_v8  ;;  %294 = vmatprep.subr.bf16.mxu1 %v1692_v11  ;;  %v1710_v22 = vld [vmem:[%s2564_s1 + $0xac] ss:$16 sps:$4 sm:$0xff]   ;;  %v1709_v23 = vld [vmem:[%s2564_s1 + $0xa0] ss:$16 sps:$4 sm:$0xff]   ;;  %v1712_v24 = vld [vmem:[%s2564_s1 + $0xc4] ss:$16 sps:$4 sm:$0xff]  }
   0x9   :  { %v1714_v25 = vld [vmem:[%s2564_s1 + $0xa8] ss:$16 sps:$4 sm:$0xff]   ;;  %v1715_v26 = vld [vmem:[%s2564_s1 + $0xc0] ss:$16 sps:$4 sm:$0xff]   ;;  %v1716_v27 = vld [vmem:[%s2564_s1 + $0xcc] ss:$16 sps:$4 sm:$0xff]  }
   0xa   :  { %v1718_v28 = vld [vmem:[%s2564_s1 + $0xe4] ss:$16 sps:$4 sm:$0xff]   ;;  %v1720_v29 = vld [vmem:[%s2564_s1 + $0xc8] ss:$16 sps:$4 sm:$0xff]   ;;  %v1722_v30 = vld [vmem:[%s2564_s1 + $0xec] ss:$16 sps:$4 sm:$0xff]  }
   0xb   :  { %252 = vmatpush1.bf16.msra.mxu0 %v1691_v10  ;;  %295 = vmatpush1.bf16.msra.mxu1 %v1696_v13  ;;  %v1721_v31 = vld [vmem:[%s2564_s1 + $0xe0] ss:$16 sps:$4 sm:$0xff]   ;;  %v1725_v32 = vld [vmem:[%s2564_s1 + $0xe8] ss:$16 sps:$4 sm:$0xff]  }
   0xc   :  { %253 = vmatprep.subr.bf16.mxu0 %v1694_v12  ;;  %296 = vmatprep.subr.bf16.mxu1 %v1698_v14  ;;  %v1724_v33 = vld [vmem:[%s2563_s0] sm:$0xff]  }
   0xf   :  { %254 = vmatpush1.bf16.msra.mxu0 %v1697_v15  ;;  %297 = vmatpush1.bf16.msra.mxu1 %v1702_v17 }
  0x10   :  { %255 = vmatprep.subr.bf16.mxu0 %v1700_v16  ;;  %298 = vmatprep.subr.bf16.mxu1 %v1704_v18 }
  0x13   :  { %256 = vmatpush1.bf16.msra.mxu0 %v1703_v19  ;;  %299 = vmatpush1.bf16.msra.mxu1 %v1708_v21 }
  0x14   :  { %257 = vmatprep.subr.bf16.mxu0 %v1706_v20  ;;  %300 = vmatprep.subr.bf16.mxu1 %v1710_v22 }
  0x17   :  { %258 = vmatpush1.bf16.msra.mxu0 %v1709_v23  ;;  %301 = vmatpush1.bf16.msra.mxu1 %v1714_v25 }
  0x18   :  { %259 = vmatprep.subr.bf16.mxu0 %v1712_v24  ;;  %302 = vmatprep.subr.bf16.mxu1 %v1716_v27 }
  0x1b   :  { %260 = vmatpush1.bf16.msra.mxu0 %v1715_v26  ;;  %303 = vmatpush1.bf16.msra.mxu1 %v1720_v29 }
  0x1c   :  { %261 = vmatprep.subr.bf16.mxu0 %v1718_v28  ;;  %304 = vmatprep.subr.bf16.mxu1 %v1722_v30 }
  0x1f   :  { %262 = vmatpush1.bf16.msra.mxu0 %v1721_v31  ;;  %305 = vmatpush1.bf16.msra.mxu1 %v1725_v32 }
  0x20   :  { %11 = vsyncpa [#allocation4], 0  ;;  %v2040_v34 = vld [vmem:[%s2565_s2 + $0x4] ss:$16 sps:$4 sm:$0xff]   ;;  %v2045_v35 = vld [vmem:[%s2565_s2 + $0xc] ss:$16 sps:$4 sm:$0xff]   ;;  %v61_v3 = vlaneseq }
  0x21   :  { %v2050_v36 = vld [vmem:[%s2565_s2] ss:$16 sps:$4 sm:$0xff]   ;;  %v2055_v37 = vld [vmem:[%s2565_s2 + $0x8] ss:$16 sps:$4 sm:$0xff]   ;;  %v2060_v38 = vld [vmem:[%s2565_s2 + $0x24] ss:$16 sps:$4 sm:$0xff]   ;;  %553 = vmatprep.subr.bf16.mxu0 %v2040_v34  ;;  %594 = vmatprep.subr.bf16.mxu1 %v2045_v35 }
  0x22   :  { %280 = vmatmul.mubr.bf16.vlgmr.msra.gmra.mrb[0].mxu0 %v1724_v33  ;;  %323 = vmatmul.mubr.bf16.vlgmr.msra.gmra.mrb[0].mxu1 %v1724_v33  ;;  %v2065_v39 = vld [vmem:[%s2565_s2 + $0x2c] ss:$16 sps:$4 sm:$0xff]   ;;  %v2074_v40 = vld [vmem:[%s2565_s2 + $0x20] ss:$16 sps:$4 sm:$0xff]   ;;  %v2079_v41 = vld [vmem:[%s2565_s2 + $0x28] ss:$16 sps:$4 sm:$0xff]  }
  0x23   :  { %585 = vmatprep.mubr.bf16.mxu0 %v1894_v2  ;;  %626 = vmatprep.mubr.bf16.mxu1 %v1894_v2  ;;  %v2086_v42 = vld [vmem:[%s2565_s2 + $0x44] ss:$16 sps:$4 sm:$0xff]   ;;  %v2091_v43 = vld [vmem:[%s2565_s2 + $0x4c] ss:$16 sps:$4 sm:$0xff]   ;;  %v2098_v44 = vld [vmem:[%s2565_s2 + $0x40] ss:$16 sps:$4 sm:$0xff]  }
  0x24   :  { %554 = vmatpush1.bf16.msra.mxu0 %v2050_v36  ;;  %595 = vmatpush1.bf16.msra.mxu1 %v2055_v37  ;;  %v2103_v45 = vld [vmem:[%s2565_s2 + $0x48] ss:$16 sps:$4 sm:$0xff]   ;;  %v2110_v46 = vld [vmem:[%s2565_s2 + $0x64] ss:$16 sps:$4 sm:$0xff]   ;;  %v2115_v47 = vld [vmem:[%s2565_s2 + $0x6c] ss:$16 sps:$4 sm:$0xff]  }
  0x25   :  { %555 = vmatprep.subr.bf16.mxu0 %v2060_v38  ;;  %596 = vmatprep.subr.bf16.mxu1 %v2065_v39  ;;  %v2122_v48 = vld [vmem:[%s2565_s2 + $0x60] ss:$16 sps:$4 sm:$0xff]   ;;  %v2127_v49 = vld [vmem:[%s2565_s2 + $0x68] ss:$16 sps:$4 sm:$0xff]   ;;  %v2134_v50 = vld [vmem:[%s2565_s2 + $0x84] ss:$16 sps:$4 sm:$0xff]  }
  0x26   :  { %v2139_v51 = vld [vmem:[%s2565_s2 + $0x8c] ss:$16 sps:$4 sm:$0xff]   ;;  %v2146_v52 = vld [vmem:[%s2565_s2 + $0x80] ss:$16 sps:$4 sm:$0xff]   ;;  %v2151_v53 = vld [vmem:[%s2565_s2 + $0x88] ss:$16 sps:$4 sm:$0xff]  }
  0x27   :  { %v2158_v54 = vld [vmem:[%s2565_s2 + $0xa4] ss:$16 sps:$4 sm:$0xff]   ;;  %v2163_v55 = vld [vmem:[%s2565_s2 + $0xac] ss:$16 sps:$4 sm:$0xff]   ;;  %v2170_v56 = vld [vmem:[%s2565_s2 + $0xa0] ss:$16 sps:$4 sm:$0xff]  }
  0x28   :  { %556 = vmatpush1.bf16.msra.mxu0 %v2074_v40  ;;  %597 = vmatpush1.bf16.msra.mxu1 %v2079_v41  ;;  %v2175_v57 = vld [vmem:[%s2565_s2 + $0xa8] ss:$16 sps:$4 sm:$0xff]   ;;  %v2182_v58 = vld [vmem:[%s2565_s2 + $0xc4] ss:$16 sps:$4 sm:$0xff]   ;;  %v2187_v59 = vld [vmem:[%s2565_s2 + $0xcc] ss:$16 sps:$4 sm:$0xff]  }
  0x29   :  { %557 = vmatprep.subr.bf16.mxu0 %v2086_v42  ;;  %598 = vmatprep.subr.bf16.mxu1 %v2091_v43  ;;  %v2194_v60 = vld [vmem:[%s2565_s2 + $0xc0] ss:$16 sps:$4 sm:$0xff]   ;;  %v2199_v61 = vld [vmem:[%s2565_s2 + $0xc8] ss:$16 sps:$4 sm:$0xff]   ;;  %v2206_v62 = vld [vmem:[%s2565_s2 + $0xe4] ss:$16 sps:$4 sm:$0xff]  }
  0x2a   :  { %v2211_v63 = vld [vmem:[%s2565_s2 + $0xec] ss:$16 sps:$4 sm:$0xff]   ;;  %v2218_v0 = vld [vmem:[%s2565_s2 + $0xe0] ss:$16 sps:$4 sm:$0xff]   ;;  %v2223_v1 = vld [vmem:[%s2565_s2 + $0xe8] ss:$16 sps:$4 sm:$0xff]  }
  0x2b   :  { %v62_v4 = vshrl.u32 %v61_v3, 7  ;;  %v59_v6 = vld [vmem:[%s2566_s3] sm:$0xf]  ;;  %vm1896_vm0 = vmmov 0   ;;  %s1898_s15 = smov [#allocation3]  }
  0x2c   :  { %558 = vmatpush1.bf16.msra.mxu0 %v2098_v44  ;;  %599 = vmatpush1.bf16.msra.mxu1 %v2103_v45  ;;  %s1522_s16 = sshll.u32 %s1898_s15, 4  ;;  %s1523_s16 = int_to_ptr.vmem [resolvable:$true] %s1522_s16 }
  0x2d   :  { %559 = vmatprep.subr.bf16.mxu0 %v2110_v46  ;;  %600 = vmatprep.subr.bf16.mxu1 %v2115_v47  ;;  %v63_v5 = vsub.s32 0, %v62_v4  ;;  %v67_v7 = vsub.s32 1, %v62_v4  ;;  %v71_v8 = vsub.s32 2, %v62_v4  ;;  %v75_v9 = vsub.s32 3, %v62_v4  ;;  %s1870_s1 = scalar_lea.vmem %s1523_s16, 32  ;;  %p1875_p1 = scmp.lt.s32.totalorder %s1523_s16, %s1523_s16 }
  0x2e   :  { %p1871_p0 = scmp.ne.s32.totalorder %s1523_s16, %s1870_s1  ;;  %p1876_p2 = scmp.lt.s32.totalorder %s1870_s1, %s1870_s1 }
  0x2f   :  { %v64_v10 = vrot.slane %v59_v6, %v63_v5  ;;  %v68_v11 = vrot.slane %v59_v6, %v67_v7  ;;  %v72_v12 = vrot.slane %v59_v6, %v71_v8  ;;  %v76_v14 = vrot.slane %v59_v6, %v75_v9 }
  0x30   :  { %560 = vmatpush1.bf16.msra.mxu0 %v2122_v48  ;;  %601 = vmatpush1.bf16.msra.mxu1 %v2127_v49  ;;  %p1877_p3 = por %p1876_p2, %p1875_p1 }
  0x31   :  { %561 = vmatprep.subr.bf16.mxu0 %v2134_v50  ;;  %602 = vmatprep.subr.bf16.mxu1 %v2139_v51 }
  0x32   :  { %p1878_p4 = pnand %p1877_p3, %p1871_p0 }
  0x34   :  { %562 = vmatpush1.bf16.msra.mxu0 %v2146_v52  ;;  %603 = vmatpush1.bf16.msra.mxu1 %v2151_v53 }
  0x35   :  { %563 = vmatprep.subr.bf16.mxu0 %v2158_v54  ;;  %604 = vmatprep.subr.bf16.mxu1 %v2163_v55 }
  0x38   :  { %564 = vmatpush1.bf16.msra.mxu0 %v2170_v56  ;;  %605 = vmatpush1.bf16.msra.mxu1 %v2175_v57 }
  0x39   :  { %565 = vmatprep.subr.bf16.mxu0 %v2182_v58  ;;  %606 = vmatprep.subr.bf16.mxu1 %v2187_v59 }
  0x3c   :  { %566 = vmatpush1.bf16.msra.mxu0 %v2194_v60  ;;  %607 = vmatpush1.bf16.msra.mxu1 %v2199_v61 }
  0x3d   :  { %567 = vmatprep.subr.bf16.mxu0 %v2206_v62  ;;  %608 = vmatprep.subr.bf16.mxu1 %v2211_v63 }
  0x40   :  { %568 = vmatpush1.bf16.msra.mxu0 %v2218_v0  ;;  %609 = vmatpush1.bf16.msra.mxu1 %v2223_v1 }
  0x41   :  { %680 = vmatprep.subr.bf16.mxu0 %v2040_v34  ;;  %721 = vmatprep.subr.bf16.mxu1 %v2045_v35 }
  0xf5   :  { %v281_v13 = vpop.f32.mrb[0].mxu0  ;;  %v324_v19 = vpop.f32.mrb[0].mxu1 }
  0xf6   :  { %v282_v15 = vadd.f32 %v281_v13, %v64_v10  ;;  %v283_v16 = vpop.f32.mrb[1].mxu0  ;;  %v325_v22 = vadd.f32 %v324_v19, %v72_v12  ;;  %v326_v23 = vpop.f32.mrb[1].mxu1 }
  0xf7   :  { %v284_v17 = vadd.f32 %v283_v16, %v68_v11  ;;  %v285_v18 = vpop.f32.mrb[2].mxu0  ;;  %v327_v25 = vadd.f32 %v326_v23, %v76_v14  ;;  %v328_v26 = vpop.f32.mrb[2].mxu1 }
  0xf8   :  { %333 = vst [vmem:[#allocation2] sm:$0xff] %v282_v15  ;;  %v286_v20 = vadd.f32 %v285_v18, %v64_v10  ;;  %v287_v21 = vpop.f32.mrb[3].mxu0  ;;  %335 = vst [vmem:[#allocation2 + $0x10] sm:$0xff] %v325_v22  ;;  %v329_v27 = vadd.f32 %v328_v26, %v72_v12  ;;  %v330_v28 = vpop.f32.mrb[3].mxu1 }
  0xf9   :  { %334 = vst [vmem:[#allocation2 + $0x8] sm:$0xff] %v284_v17  ;;  %v288_v24 = vadd.f32 %v287_v21, %v68_v11  ;;  %336 = vst [vmem:[#allocation2 + $0x18] sm:$0xff] %v327_v25  ;;  %v331_v29 = vadd.f32 %v330_v28, %v76_v14 }
  0xfa   :  { %337 = vst [vmem:[#allocation2 + $0x20] sm:$0xff] %v286_v20  ;;  %339 = vst [vmem:[#allocation2 + $0x30] sm:$0xff] %v329_v27 }
  0xfb   :  { %338 = vst [vmem:[#allocation2 + $0x28] sm:$0xff] %v288_v24  ;;  %340 = vst [vmem:[#allocation2 + $0x38] sm:$0xff] %v331_v29 }
  0xff   :  { %v341_v30 = vld [vmem:[#allocation2] sm:$0x3]  ;;  %v342_v32 = vld [vmem:[#allocation2 + $0x10] sm:$0x3]  ;;  %v356_v20 = vld [vmem:[#allocation2] sm:$0xc] }
 0x100   :  { %v344_v31 = vmul.f32 0.5, %v341_v30  ;;  %v343_v33 = vld [vmem:[#allocation2 + $0x18] sm:$0x3]  ;;  %v357_v26 = vld [vmem:[#allocation2 + $0x8] sm:$0xc] }
 0x101   :  { %v349_v3 = vmul.f32 0.5, %v343_v33 }
 0x102   :  { %1774 = vtanh.f32 %v344_v31  ;;  %v358_v31 = vld [vmem:[#allocation2 + $0x10] sm:$0xc] }
 0x103   :  { %1776 = vtanh.f32 %v342_v32 }
 0x104   :  { %1778 = vtanh.f32 %v349_v3 }
 0x10c   :  { %v1775_v4 = vpop.eup %1774 }
 0x10d   :  { %v346_v5 = vadd.f32 1.0, %v1775_v4  ;;  %v1777_v6 = vpop.eup %1776  ;;  %v359_v4 = vld [vmem:[#allocation2 + $0x18] sm:$0xc] }
 0x10e   :  { %v1779_v9 = vpop.eup %1778 }
 0x10f   :  { %v347_v7 = vmul.f32 0.5, %v346_v5  ;;  %v351_v10 = vadd.f32 1.0, %v1779_v9 }
 0x111   :  { %v2234_v8 = vmul.f32 %v1777_v6, %v347_v7  ;;  %v352_v11 = vmul.f32 0.5, %v351_v10 }
 0x113   :  { %1780 = vtanh.f32 %v2234_v8 }
 0x11d   :  { %v1781_v12 = vpop.eup %1780 }
 0x11e   :  { %v355_v13 = vmul.f32 %v1781_v12, %v352_v11 }
 0x120   :  { %v360_v14 = vpack.c.bf16 %v355_v13, %v355_v13 }
 0x122   :  { %586 = vmatmul.mubr.bf16.vlgmr.msra.gmra.mrb[4].mxu0 %v360_v14  ;;  %627 = vmatmul.mubr.bf16.vlgmr.msra.gmra.mrb[4].mxu1 %v360_v14 }
 0x123   :  { %681 = vmatpush1.bf16.msra.mxu0 %v2050_v36  ;;  %722 = vmatpush1.bf16.msra.mxu1 %v2055_v37 }
 0x124   :  { %682 = vmatprep.subr.bf16.mxu0 %v2060_v38  ;;  %723 = vmatprep.subr.bf16.mxu1 %v2065_v39 }
 0x125   :  { %712 = vmatprep.mubr.bf16.mxu0 %v1894_v2  ;;  %753 = vmatprep.mubr.bf16.mxu1 %v1894_v2 }
 0x127   :  { %683 = vmatpush1.bf16.msra.mxu0 %v2074_v40  ;;  %724 = vmatpush1.bf16.msra.mxu1 %v2079_v41 }
 0x128   :  { %684 = vmatprep.subr.bf16.mxu0 %v2086_v42  ;;  %725 = vmatprep.subr.bf16.mxu1 %v2091_v43 }
 0x12b   :  { %685 = vmatpush1.bf16.msra.mxu0 %v2098_v44  ;;  %726 = vmatpush1.bf16.msra.mxu1 %v2103_v45 }
 0x12c   :  { %686 = vmatprep.subr.bf16.mxu0 %v2110_v46  ;;  %727 = vmatprep.subr.bf16.mxu1 %v2115_v47 }
 0x12f   :  { %687 = vmatpush1.bf16.msra.mxu0 %v2122_v48  ;;  %728 = vmatpush1.bf16.msra.mxu1 %v2127_v49 }
 0x130   :  { %688 = vmatprep.subr.bf16.mxu0 %v2134_v50  ;;  %729 = vmatprep.subr.bf16.mxu1 %v2139_v51 }
 0x133   :  { %689 = vmatpush1.bf16.msra.mxu0 %v2146_v52  ;;  %730 = vmatpush1.bf16.msra.mxu1 %v2151_v53 }
 0x134   :  { %690 = vmatprep.subr.bf16.mxu0 %v2158_v54  ;;  %731 = vmatprep.subr.bf16.mxu1 %v2163_v55 }
 0x137   :  { %691 = vmatpush1.bf16.msra.mxu0 %v2170_v56  ;;  %732 = vmatpush1.bf16.msra.mxu1 %v2175_v57 }
 0x138   :  { %692 = vmatprep.subr.bf16.mxu0 %v2182_v58  ;;  %733 = vmatprep.subr.bf16.mxu1 %v2187_v59 }
 0x13b   :  { %693 = vmatpush1.bf16.msra.mxu0 %v2194_v60  ;;  %734 = vmatpush1.bf16.msra.mxu1 %v2199_v61 }
 0x13c   :  { %694 = vmatprep.subr.bf16.mxu0 %v2206_v62  ;;  %735 = vmatprep.subr.bf16.mxu1 %v2211_v63 }
 0x13f   :  { %695 = vmatpush1.bf16.msra.mxu0 %v2218_v0  ;;  %736 = vmatpush1.bf16.msra.mxu1 %v2223_v1 }
 0x140   :  { %807 = vmatprep.subr.bf16.mxu0 %v2040_v34  ;;  %848 = vmatprep.subr.bf16.mxu1 %v2045_v35 }
 0x1f5   :  { %v587_v15 = vpop.f32.mrb[4].mxu0  ;;  %v628_v16 = vpop.f32.mrb[4].mxu1 }
 0x1f6   :  { %v639_v17 = vrot.slane %v587_v15, 6  ;;  %v589_v18 = vpop.f32.mrb[5].mxu0  ;;  %v630_v19 = vpop.f32.mrb[5].mxu1  ;;  %v641_v25 = vrot.slane %v628_v16, 6  ;;  %v665_v15 = vrot.slane %v2234_v8, 6 }
 0x1f7   :  { %v640_v21 = vrot.slane %v589_v18, 6  ;;  %v591_v22 = vpop.f32.mrb[6].mxu0  ;;  %v632_v23 = vpop.f32.mrb[6].mxu1  ;;  %v642_v3 = vrot.slane %v630_v19, 6 }
 0x1f8   :  { %v647_v24 = vadd.f32 %v639_v17, %v356_v20  ;;  %v592_v27 = vpop.f32.mrb[7].mxu0  ;;  %v633_v28 = vpop.f32.mrb[7].mxu1  ;;  %v649_v33 = vadd.f32 %v641_v25, %v358_v31 }
 0x1f9   :  { %v648_v29 = vadd.f32 %v640_v21, %v357_v26  ;;  %v650_v5 = vadd.f32 %v642_v3, %v359_v4 }
 0x1fa   :  { %v651_v30 = vmul.f32 0.5, %v647_v24 }
 0x1fb   :  { %v655_v32 = vmul.f32 0.5, %v648_v29  ;;  %v660_v6 = vmul.f32 0.5, %v650_v5  ;;  %v673_v5 = vld [vmem:[#allocation2 + $0x8] sm:$0x30] }
 0x1fc   :  { %1782 = vtanh.f32 %v651_v30  ;;  %v672_v30 = vld [vmem:[#allocation2] sm:$0x30] }
 0x1fd   :  { %1784 = vtanh.f32 %v655_v32 }
 0x1fe   :  { %1786 = vtanh.f32 %v649_v33 }
 0x1ff   :  { %1788 = vtanh.f32 %v660_v6 }
 0x206   :  { %v1783_v7 = vpop.eup %1782 }
 0x207   :  { %v1785_v9 = vpop.eup %1784  ;;  %v653_v10 = vadd.f32 1.0, %v1783_v7 }
 0x208   :  { %v657_v11 = vadd.f32 1.0, %v1785_v9  ;;  %v1787_v13 = vpop.eup %1786 }
 0x209   :  { %v654_v12 = vmul.f32 0.5, %v653_v10  ;;  %v1789_v19 = vpop.eup %1788 }
 0x20a   :  { %v658_v14 = vmul.f32 0.5, %v657_v11  ;;  %v662_v20 = vadd.f32 1.0, %v1789_v19  ;;  %v674_v11 = vld [vmem:[#allocation2 + $0x10] sm:$0x30] }
 0x20b   :  { %v668_v16 = vmul.f32 %v1787_v13, %v654_v12 }
 0x20c   :  { %v667_v17 = vmul.f32 %v665_v15, %v658_v14  ;;  %v663_v21 = vmul.f32 0.5, %v662_v20  ;;  %v675_v15 = vld [vmem:[#allocation2 + $0x18] sm:$0x30] }
 0x20e   :  { %v2272_v18 = vadd.f32 %v668_v16, %v667_v17 }
 0x210   :  { %1790 = vtanh.f32 %v2272_v18 }
 0x21a   :  { %v1791_v22 = vpop.eup %1790 }
 0x21b   :  { %v671_v23 = vmul.f32 %v1791_v22, %v663_v21 }
 0x21d   :  { %v676_v24 = vpack.c.bf16 %v671_v23, %v671_v23 }
 0x21f   :  { %v678_v25 = vrot.slane %v676_v24, 1 }
 0x221   :  { %713 = vmatmul.mubr.bf16.vlgmr.msra.gmra.mrb[8].mxu0 %v678_v25  ;;  %754 = vmatmul.mubr.bf16.vlgmr.msra.gmra.mrb[8].mxu1 %v678_v25 }
 0x222   :  { %808 = vmatpush1.bf16.msra.mxu0 %v2050_v36  ;;  %849 = vmatpush1.bf16.msra.mxu1 %v2055_v37 }
 0x223   :  { %809 = vmatprep.subr.bf16.mxu0 %v2060_v38  ;;  %850 = vmatprep.subr.bf16.mxu1 %v2065_v39 }
 0x224   :  { %839 = vmatprep.mubr.bf16.mxu0 %v1894_v2  ;;  %880 = vmatprep.mubr.bf16.mxu1 %v1894_v2 }
 0x226   :  { %810 = vmatpush1.bf16.msra.mxu0 %v2074_v40  ;;  %851 = vmatpush1.bf16.msra.mxu1 %v2079_v41 }
 0x227   :  { %811 = vmatprep.subr.bf16.mxu0 %v2086_v42  ;;  %852 = vmatprep.subr.bf16.mxu1 %v2091_v43 }
 0x22a   :  { %812 = vmatpush1.bf16.msra.mxu0 %v2098_v44  ;;  %853 = vmatpush1.bf16.msra.mxu1 %v2103_v45 }
 0x22b   :  { %813 = vmatprep.subr.bf16.mxu0 %v2110_v46  ;;  %854 = vmatprep.subr.bf16.mxu1 %v2115_v47 }
 0x22e   :  { %814 = vmatpush1.bf16.msra.mxu0 %v2122_v48  ;;  %855 = vmatpush1.bf16.msra.mxu1 %v2127_v49 }
 0x22f   :  { %815 = vmatprep.subr.bf16.mxu0 %v2134_v50  ;;  %856 = vmatprep.subr.bf16.mxu1 %v2139_v51 }
 0x232   :  { %816 = vmatpush1.bf16.msra.mxu0 %v2146_v52  ;;  %857 = vmatpush1.bf16.msra.mxu1 %v2151_v53 }
 0x233   :  { %817 = vmatprep.subr.bf16.mxu0 %v2158_v54  ;;  %858 = vmatprep.subr.bf16.mxu1 %v2163_v55 }
 0x236   :  { %818 = vmatpush1.bf16.msra.mxu0 %v2170_v56  ;;  %859 = vmatpush1.bf16.msra.mxu1 %v2175_v57 }
 0x237   :  { %819 = vmatprep.subr.bf16.mxu0 %v2182_v58  ;;  %860 = vmatprep.subr.bf16.mxu1 %v2187_v59 }
 0x23a   :  { %820 = vmatpush1.bf16.msra.mxu0 %v2194_v60  ;;  %861 = vmatpush1.bf16.msra.mxu1 %v2199_v61 }
 0x23b   :  { %821 = vmatprep.subr.bf16.mxu0 %v2206_v62  ;;  %862 = vmatprep.subr.bf16.mxu1 %v2211_v63 }
 0x23e   :  { %822 = vmatpush1.bf16.msra.mxu0 %v2218_v0  ;;  %863 = vmatpush1.bf16.msra.mxu1 %v2223_v1 }
 0x23f   :  { %934 = vmatprep.subr.bf16.mxu0 %v2040_v34  ;;  %975 = vmatprep.subr.bf16.mxu1 %v2045_v35 }
 0x2f4   :  { %v714_v8 = vpop.f32.mrb[8].mxu0  ;;  %v755_v26 = vpop.f32.mrb[8].mxu1 }
 0x2f5   :  { %v766_v27 = vrot.slane %v714_v8, 4  ;;  %v716_v28 = vpop.f32.mrb[9].mxu0  ;;  %v757_v29 = vpop.f32.mrb[9].mxu1  ;;  %v768_v4 = vrot.slane %v755_v26, 4  ;;  %v792_v8 = vrot.slane %v2272_v18, 6 }
 0x2f6   :  { %v767_v31 = vrot.slane %v716_v28, 4  ;;  %v718_v32 = vpop.f32.mrb[10].mxu0  ;;  %v759_v33 = vpop.f32.mrb[10].mxu1  ;;  %v769_v14 = vrot.slane %v757_v29, 4 }
 0x2f7   :  { %v774_v3 = vadd.f32 %v766_v27, %v672_v30  ;;  %v719_v6 = vpop.f32.mrb[11].mxu0  ;;  %v760_v7 = vpop.f32.mrb[11].mxu1  ;;  %v776_v13 = vadd.f32 %v768_v4, %v674_v11 }
 0x2f8   :  { %v775_v9 = vadd.f32 %v767_v31, %v673_v5  ;;  %v777_v16 = vadd.f32 %v769_v14, %v675_v15 }
 0x2f9   :  { %v778_v10 = vmul.f32 0.5, %v774_v3 }
 0x2fa   :  { %v782_v12 = vmul.f32 0.5, %v775_v9  ;;  %v787_v17 = vmul.f32 0.5, %v777_v16  ;;  %v800_v16 = vld [vmem:[#allocation2 + $0x8] sm:$0xc0] }
 0x2fb   :  { %1792 = vtanh.f32 %v778_v10  ;;  %v799_v10 = vld [vmem:[#allocation2] sm:$0xc0] }
 0x2fc   :  { %1794 = vtanh.f32 %v782_v12 }
 0x2fd   :  { %1796 = vtanh.f32 %v776_v13 }
 0x2fe   :  { %1798 = vtanh.f32 %v787_v17 }
 0x305   :  { %v1793_v19 = vpop.eup %1792 }
 0x306   :  { %v1795_v20 = vpop.eup %1794  ;;  %v780_v21 = vadd.f32 1.0, %v1793_v19 }
 0x307   :  { %v784_v22 = vadd.f32 1.0, %v1795_v20  ;;  %v1797_v24 = vpop.eup %1796 }
 0x308   :  { %v781_v23 = vmul.f32 0.5, %v780_v21  ;;  %v1799_v29 = vpop.eup %1798 }
 0x309   :  { %v785_v25 = vmul.f32 0.5, %v784_v22  ;;  %v789_v30 = vadd.f32 1.0, %v1799_v29  ;;  %v801_v22 = vld [vmem:[#allocation2 + $0x10] sm:$0xc0] }
 0x30a   :  { %v795_v26 = vmul.f32 %v1797_v24, %v781_v23 }
 0x30b   :  { %v794_v27 = vmul.f32 %v792_v8, %v785_v25  ;;  %v790_v31 = vmul.f32 0.5, %v789_v30  ;;  %v802_v8 = vld [vmem:[#allocation2 + $0x18] sm:$0xc0] }
 0x30d   :  { %v2310_v28 = vadd.f32 %v795_v26, %v794_v27 }
 0x30f   :  { %1800 = vtanh.f32 %v2310_v28 }
 0x319   :  { %v1801_v32 = vpop.eup %1800 }
 0x31a   :  { %v798_v33 = vmul.f32 %v1801_v32, %v790_v31 }
 0x31c   :  { %v803_v3 = vpack.c.bf16 %v798_v33, %v798_v33 }
 0x31e   :  { %v805_v4 = vrot.slane %v803_v3, 2 }
 0x320   :  { %840 = vmatmul.mubr.bf16.vlgmr.msra.gmra.mrb[12].mxu0 %v805_v4  ;;  %881 = vmatmul.mubr.bf16.vlgmr.msra.gmra.mrb[12].mxu1 %v805_v4 }
 0x321   :  { %935 = vmatpush1.bf16.msra.mxu0 %v2050_v36  ;;  %976 = vmatpush1.bf16.msra.mxu1 %v2055_v37 }
 0x322   :  { %936 = vmatprep.subr.bf16.mxu0 %v2060_v38  ;;  %977 = vmatprep.subr.bf16.mxu1 %v2065_v39 }
 0x323   :  { %966 = vmatprep.mubr.bf16.mxu0 %v1894_v2  ;;  %1007 = vmatprep.mubr.bf16.mxu1 %v1894_v2 }
 0x325   :  { %937 = vmatpush1.bf16.msra.mxu0 %v2074_v40  ;;  %978 = vmatpush1.bf16.msra.mxu1 %v2079_v41 }
 0x326   :  { %938 = vmatprep.subr.bf16.mxu0 %v2086_v42  ;;  %979 = vmatprep.subr.bf16.mxu1 %v2091_v43 }
 0x329   :  { %939 = vmatpush1.bf16.msra.mxu0 %v2098_v44  ;;  %980 = vmatpush1.bf16.msra.mxu1 %v2103_v45 }
 0x32a   :  { %940 = vmatprep.subr.bf16.mxu0 %v2110_v46  ;;  %981 = vmatprep.subr.bf16.mxu1 %v2115_v47 }
 0x32d   :  { %941 = vmatpush1.bf16.msra.mxu0 %v2122_v48  ;;  %982 = vmatpush1.bf16.msra.mxu1 %v2127_v49 }
 0x32e   :  { %942 = vmatprep.subr.bf16.mxu0 %v2134_v50  ;;  %983 = vmatprep.subr.bf16.mxu1 %v2139_v51 }
 0x331   :  { %943 = vmatpush1.bf16.msra.mxu0 %v2146_v52  ;;  %984 = vmatpush1.bf16.msra.mxu1 %v2151_v53 }
 0x332   :  { %944 = vmatprep.subr.bf16.mxu0 %v2158_v54  ;;  %985 = vmatprep.subr.bf16.mxu1 %v2163_v55 }
 0x335   :  { %945 = vmatpush1.bf16.msra.mxu0 %v2170_v56  ;;  %986 = vmatpush1.bf16.msra.mxu1 %v2175_v57 }
 0x336   :  { %946 = vmatprep.subr.bf16.mxu0 %v2182_v58  ;;  %987 = vmatprep.subr.bf16.mxu1 %v2187_v59 }
 0x339   :  { %947 = vmatpush1.bf16.msra.mxu0 %v2194_v60  ;;  %988 = vmatpush1.bf16.msra.mxu1 %v2199_v61 }
 0x33a   :  { %948 = vmatprep.subr.bf16.mxu0 %v2206_v62  ;;  %989 = vmatprep.subr.bf16.mxu1 %v2211_v63 }
 0x33d   :  { %949 = vmatpush1.bf16.msra.mxu0 %v2218_v0  ;;  %990 = vmatpush1.bf16.msra.mxu1 %v2223_v1 }
 0x33e   :  { %1046 = vmatprep.subr.bf16.mxu0 %v2040_v34  ;;  %1087 = vmatprep.subr.bf16.mxu1 %v2045_v35 }
 0x3f3   :  { %v841_v18 = vpop.f32.mrb[12].mxu0  ;;  %v882_v5 = vpop.f32.mrb[12].mxu1 }
 0x3f4   :  { %v893_v6 = vrot.slane %v841_v18, 2  ;;  %v843_v7 = vpop.f32.mrb[13].mxu0  ;;  %v884_v9 = vpop.f32.mrb[13].mxu1  ;;  %v895_v15 = vrot.slane %v882_v5, 2  ;;  %v919_v18 = vrot.slane %v2310_v28, 6 }
 0x3f5   :  { %v894_v11 = vrot.slane %v843_v7, 2  ;;  %v845_v12 = vpop.f32.mrb[14].mxu0  ;;  %v886_v13 = vpop.f32.mrb[14].mxu1  ;;  %v896_v25 = vrot.slane %v884_v9, 2  ;;  %v926_v28 = vld [vmem:[#allocation2 + $0x20] sm:$0x3] }
 0x3f6   :  { %v901_v14 = vadd.f32 %v893_v6, %v799_v10  ;;  %v846_v17 = vpop.f32.mrb[15].mxu0  ;;  %v887_v19 = vpop.f32.mrb[15].mxu1  ;;  %v903_v24 = vadd.f32 %v895_v15, %v801_v22 }
 0x3f7   :  { %v902_v20 = vadd.f32 %v894_v11, %v800_v16  ;;  %v904_v26 = vadd.f32 %v896_v25, %v802_v8 }
 0x3f8   :  { %v905_v21 = vmul.f32 0.5, %v901_v14 }
 0x3f9   :  { %v909_v23 = vmul.f32 0.5, %v902_v20  ;;  %v914_v27 = vmul.f32 0.5, %v904_v26  ;;  %v927_v20 = vld [vmem:[#allocation2 + $0x28] sm:$0x3] }
 0x3fa   :  { %1802 = vtanh.f32 %v905_v21 }
 0x3fb   :  { %1804 = vtanh.f32 %v909_v23 }
 0x3fc   :  { %1806 = vtanh.f32 %v903_v24 }
 0x3fd   :  { %1808 = vtanh.f32 %v914_v27 }
 0x404   :  { %v1803_v29 = vpop.eup %1802 }
 0x405   :  { %v1805_v30 = vpop.eup %1804  ;;  %v907_v31 = vadd.f32 1.0, %v1803_v29  ;;  %v928_v29 = vld [vmem:[#allocation2 + $0x30] sm:$0x3] }
 0x406   :  { %v911_v32 = vadd.f32 1.0, %v1805_v30  ;;  %v1807_v3 = vpop.eup %1806 }
 0x407   :  { %v908_v33 = vmul.f32 0.5, %v907_v31  ;;  %v1809_v9 = vpop.eup %1808 }
 0x408   :  { %v912_v4 = vmul.f32 0.5, %v911_v32  ;;  %v916_v10 = vadd.f32 1.0, %v1809_v9  ;;  %v929_v32 = vld [vmem:[#allocation2 + $0x38] sm:$0x3] }
 0x409   :  { %v922_v5 = vmul.f32 %v1807_v3, %v908_v33 }
 0x40a   :  { %v921_v6 = vmul.f32 %v919_v18, %v912_v4  ;;  %v917_v11 = vmul.f32 0.5, %v916_v10 }
 0x40c   :  { %v2348_v7 = vadd.f32 %v922_v5, %v921_v6 }
 0x40e   :  { %1810 = vtanh.f32 %v2348_v7 }
 0x418   :  { %v1811_v12 = vpop.eup %1810 }
 0x419   :  { %v925_v13 = vmul.f32 %v1811_v12, %v917_v11  ;;  %v1034_v12 = vrot.slane %v2348_v7, 6  ;;  %v1044_v7 = vld [vmem:[#allocation2 + $0x38] sm:$0xc] }
 0x41b   :  { %v930_v14 = vpack.c.bf16 %v925_v13, %v925_v13 }
 0x41d   :  { %v932_v15 = vrot.slane %v930_v14, 3 }
 0x41f   :  { %967 = vmatmul.mubr.bf16.vlgmr.msra.gmra.mrb[16].mxu0 %v932_v15  ;;  %1008 = vmatmul.mubr.bf16.vlgmr.msra.gmra.mrb[16].mxu1 %v932_v15 }
 0x420   :  { %1047 = vmatpush1.bf16.msra.mxu0 %v2050_v36  ;;  %1088 = vmatpush1.bf16.msra.mxu1 %v2055_v37 }
 0x421   :  { %1048 = vmatprep.subr.bf16.mxu0 %v2060_v38  ;;  %1089 = vmatprep.subr.bf16.mxu1 %v2065_v39 }
 0x422   :  { %1078 = vmatprep.mubr.bf16.mxu0 %v1894_v2  ;;  %1119 = vmatprep.mubr.bf16.mxu1 %v1894_v2 }
 0x424   :  { %1049 = vmatpush1.bf16.msra.mxu0 %v2074_v40  ;;  %1090 = vmatpush1.bf16.msra.mxu1 %v2079_v41 }
 0x425   :  { %1050 = vmatprep.subr.bf16.mxu0 %v2086_v42  ;;  %1091 = vmatprep.subr.bf16.mxu1 %v2091_v43 }
 0x428   :  { %1051 = vmatpush1.bf16.msra.mxu0 %v2098_v44  ;;  %1092 = vmatpush1.bf16.msra.mxu1 %v2103_v45 }
 0x429   :  { %1052 = vmatprep.subr.bf16.mxu0 %v2110_v46  ;;  %1093 = vmatprep.subr.bf16.mxu1 %v2115_v47 }
 0x42c   :  { %1053 = vmatpush1.bf16.msra.mxu0 %v2122_v48  ;;  %1094 = vmatpush1.bf16.msra.mxu1 %v2127_v49 }
 0x42d   :  { %1054 = vmatprep.subr.bf16.mxu0 %v2134_v50  ;;  %1095 = vmatprep.subr.bf16.mxu1 %v2139_v51 }
 0x430   :  { %1055 = vmatpush1.bf16.msra.mxu0 %v2146_v52  ;;  %1096 = vmatpush1.bf16.msra.mxu1 %v2151_v53 }
 0x431   :  { %1056 = vmatprep.subr.bf16.mxu0 %v2158_v54  ;;  %1097 = vmatprep.subr.bf16.mxu1 %v2163_v55 }
 0x434   :  { %1057 = vmatpush1.bf16.msra.mxu0 %v2170_v56  ;;  %1098 = vmatpush1.bf16.msra.mxu1 %v2175_v57 }
 0x435   :  { %1058 = vmatprep.subr.bf16.mxu0 %v2182_v58  ;;  %1099 = vmatprep.subr.bf16.mxu1 %v2187_v59 }
 0x438   :  { %1059 = vmatpush1.bf16.msra.mxu0 %v2194_v60  ;;  %1100 = vmatpush1.bf16.msra.mxu1 %v2199_v61 }
 0x439   :  { %1060 = vmatprep.subr.bf16.mxu0 %v2206_v62  ;;  %1101 = vmatprep.subr.bf16.mxu1 %v2211_v63 }
 0x43c   :  { %1061 = vmatpush1.bf16.msra.mxu0 %v2218_v0  ;;  %1102 = vmatpush1.bf16.msra.mxu1 %v2223_v1 }
 0x43d   :  { %1173 = vmatprep.subr.bf16.mxu0 %v2040_v34  ;;  %1214 = vmatprep.subr.bf16.mxu1 %v2045_v35 }
 0x4f2   :  { %v968_v16 = vpop.f32.mrb[16].mxu0  ;;  %v1009_v17 = vpop.f32.mrb[16].mxu1 }
 0x4f3   :  { %v1016_v19 = vadd.f32 %v968_v16, %v926_v28  ;;  %v970_v21 = vpop.f32.mrb[17].mxu0  ;;  %v1011_v22 = vpop.f32.mrb[17].mxu1  ;;  %v1018_v31 = vadd.f32 %v1009_v17, %v928_v29 }
 0x4f4   :  { %v1017_v23 = vadd.f32 %v970_v21, %v927_v20  ;;  %v972_v24 = vpop.f32.mrb[18].mxu0  ;;  %v1013_v25 = vpop.f32.mrb[18].mxu1  ;;  %v1019_v33 = vadd.f32 %v1011_v22, %v929_v32 }
 0x4f5   :  { %v1020_v8 = vmul.f32 0.5, %v1016_v19  ;;  %v973_v26 = vpop.f32.mrb[19].mxu0  ;;  %v1014_v27 = vpop.f32.mrb[19].mxu1 }
 0x4f6   :  { %v1024_v30 = vmul.f32 0.5, %v1017_v23  ;;  %v1029_v3 = vmul.f32 0.5, %v1019_v33 }
 0x4f7   :  { %1812 = vtanh.f32 %v1020_v8 }
 0x4f8   :  { %1814 = vtanh.f32 %v1024_v30 }
 0x4f9   :  { %1816 = vtanh.f32 %v1018_v31 }
 0x4fa   :  { %1818 = vtanh.f32 %v1029_v3 }
 0x501   :  { %v1813_v4 = vpop.eup %1812 }
 0x502   :  { %v1815_v18 = vpop.eup %1814  ;;  %v1022_v5 = vadd.f32 1.0, %v1813_v4 }
 0x503   :  { %v1026_v6 = vadd.f32 1.0, %v1815_v18  ;;  %v1817_v10 = vpop.eup %1816 }
 0x504   :  { %v1023_v9 = vmul.f32 0.5, %v1022_v5  ;;  %v1819_v28 = vpop.eup %1818 }
 0x505   :  { %v1027_v11 = vmul.f32 0.5, %v1026_v6  ;;  %v1031_v16 = vadd.f32 1.0, %v1819_v28  ;;  %v1856_v28 = vld [vmem:[%s2565_s2 + $0x20] ss:$16 sps:$4 sm:$0xff]  }
 0x506   :  { %v1037_v13 = vmul.f32 %v1817_v10, %v1023_v9 }
 0x507   :  { %v1036_v14 = vmul.f32 %v1034_v12, %v1027_v11  ;;  %v1032_v17 = vmul.f32 0.5, %v1031_v16  ;;  %v1852_v12 = vld [vmem:[%s2565_s2] ss:$16 sps:$4 sm:$0xff]   ;;  %v1857_v16 = vld [vmem:[%s2565_s2 + $0x28] ss:$16 sps:$4 sm:$0xff]  }
 0x509   :  { %v2386_v15 = vadd.f32 %v1037_v13, %v1036_v14  ;;  %v1853_v13 = vld [vmem:[%s2565_s2 + $0x8] ss:$16 sps:$4 sm:$0xff]   ;;  %v1854_v14 = vld [vmem:[%s2565_s2 + $0x24] ss:$16 sps:$4 sm:$0xff]  }
 0x50b   :  { %1820 = vtanh.f32 %v2386_v15  ;;  %v1158_v31 = vrot.slane %v2386_v15, 6  ;;  %v1855_v15 = vld [vmem:[%s2565_s2 + $0x2c] ss:$16 sps:$4 sm:$0xff]  }
 0x515   :  { %v1821_v19 = vpop.eup %1820 }
 0x516   :  { %v1040_v20 = vmul.f32 %v1821_v19, %v1032_v17  ;;  %v1858_v17 = vld [vmem:[%s2565_s2 + $0x44] ss:$16 sps:$4 sm:$0xff]   ;;  %v1859_v19 = vld [vmem:[%s2565_s2 + $0x4c] ss:$16 sps:$4 sm:$0xff]  }
 0x518   :  { %v1045_v21 = vpack.c.bf16 %v1040_v20, %v1040_v20  ;;  %v1861_v20 = vld [vmem:[%s2565_s2 + $0x48] ss:$16 sps:$4 sm:$0xff]  }
 0x51a   :  { %1079 = vmatmul.mubr.bf16.vlgmr.msra.gmra.mrb[20].mxu0 %v1045_v21  ;;  %1120 = vmatmul.mubr.bf16.vlgmr.msra.gmra.mrb[20].mxu1 %v1045_v21  ;;  %v1862_v21 = vld [vmem:[%s2565_s2 + $0x64] ss:$16 sps:$4 sm:$0xff]  }
 0x51b   :  { %1174 = vmatpush1.bf16.msra.mxu0 %v2050_v36  ;;  %1215 = vmatpush1.bf16.msra.mxu1 %v2055_v37 }
 0x51c   :  { %1175 = vmatprep.subr.bf16.mxu0 %v2060_v38  ;;  %1216 = vmatprep.subr.bf16.mxu1 %v2065_v39 }
 0x51d   :  { %1205 = vmatprep.mubr.bf16.mxu0 %v1894_v2  ;;  %1246 = vmatprep.mubr.bf16.mxu1 %v1894_v2 }
 0x51f   :  { %1176 = vmatpush1.bf16.msra.mxu0 %v2074_v40  ;;  %1217 = vmatpush1.bf16.msra.mxu1 %v2079_v41  ;;  %v1041_v41 = vld [vmem:[#allocation2 + $0x20] sm:$0xc] }
 0x520   :  { %1177 = vmatprep.subr.bf16.mxu0 %v2086_v42  ;;  %1218 = vmatprep.subr.bf16.mxu1 %v2091_v43 }
 0x523   :  { %1178 = vmatpush1.bf16.msra.mxu0 %v2098_v44  ;;  %1219 = vmatpush1.bf16.msra.mxu1 %v2103_v45 }
 0x524   :  { %1179 = vmatprep.subr.bf16.mxu0 %v2110_v46  ;;  %1220 = vmatprep.subr.bf16.mxu1 %v2115_v47  ;;  %v1042_v47 = vld [vmem:[#allocation2 + $0x28] sm:$0xc] }
 0x527   :  { %1180 = vmatpush1.bf16.msra.mxu0 %v2122_v48  ;;  %1221 = vmatpush1.bf16.msra.mxu1 %v2127_v49 }
 0x528   :  { %1181 = vmatprep.subr.bf16.mxu0 %v2134_v50  ;;  %1222 = vmatprep.subr.bf16.mxu1 %v2139_v51 }
 0x52b   :  { %1182 = vmatpush1.bf16.msra.mxu0 %v2146_v52  ;;  %1223 = vmatpush1.bf16.msra.mxu1 %v2151_v53  ;;  %v1043_v52 = vld [vmem:[#allocation2 + $0x30] sm:$0xc] }
 0x52c   :  { %1183 = vmatprep.subr.bf16.mxu0 %v2158_v54  ;;  %1224 = vmatprep.subr.bf16.mxu1 %v2163_v55 }
 0x52f   :  { %1184 = vmatpush1.bf16.msra.mxu0 %v2170_v56  ;;  %1225 = vmatpush1.bf16.msra.mxu1 %v2175_v57 }
 0x530   :  { %1185 = vmatprep.subr.bf16.mxu0 %v2182_v58  ;;  %1226 = vmatprep.subr.bf16.mxu1 %v2187_v59 }
 0x533   :  { %1186 = vmatpush1.bf16.msra.mxu0 %v2194_v60  ;;  %1227 = vmatpush1.bf16.msra.mxu1 %v2199_v61 }
 0x534   :  { %1187 = vmatprep.subr.bf16.mxu0 %v2206_v62  ;;  %1228 = vmatprep.subr.bf16.mxu1 %v2211_v63 }
 0x537   :  { %1188 = vmatpush1.bf16.msra.mxu0 %v2218_v0  ;;  %1229 = vmatpush1.bf16.msra.mxu1 %v2223_v1 }
 0x538   :  { %1300 = vmatprep.subr.bf16.mxu0 %v2040_v34  ;;  %1341 = vmatprep.subr.bf16.mxu1 %v2045_v35 }
 0x5ed   :  { %v1080_v36 = vpop.f32.mrb[20].mxu0  ;;  %v1121_v37 = vpop.f32.mrb[20].mxu1 }
 0x5ee   :  { %v1132_v38 = vrot.slane %v1080_v36, 6  ;;  %v1082_v39 = vpop.f32.mrb[21].mxu0  ;;  %v1123_v40 = vpop.f32.mrb[21].mxu1  ;;  %v1134_v46 = vrot.slane %v1121_v37, 6  ;;  %v1863_v36 = vld [vmem:[%s2565_s2 + $0x6c] ss:$16 sps:$4 sm:$0xff]  }
 0x5ef   :  { %v1133_v42 = vrot.slane %v1082_v39, 6  ;;  %v1084_v43 = vpop.f32.mrb[22].mxu0  ;;  %v1125_v44 = vpop.f32.mrb[22].mxu1  ;;  %v1135_v53 = vrot.slane %v1123_v40, 6  ;;  %v1864_v37 = vld [vmem:[%s2565_s2 + $0x60] ss:$16 sps:$4 sm:$0xff]  }
 0x5f0   :  { %v1140_v45 = vadd.f32 %v1132_v38, %v1041_v41  ;;  %v1085_v48 = vpop.f32.mrb[23].mxu0  ;;  %v1126_v49 = vpop.f32.mrb[23].mxu1  ;;  %v1142_v35 = vadd.f32 %v1134_v46, %v1043_v52  ;;  %v1865_v38 = vld [vmem:[%s2565_s2 + $0x68] ss:$16 sps:$4 sm:$0xff]   ;;  %v1866_v39 = vld [vmem:[%s2565_s2 + $0x84] ss:$16 sps:$4 sm:$0xff]  }
 0x5f1   :  { %v1141_v50 = vadd.f32 %v1133_v42, %v1042_v47  ;;  %v1143_v22 = vadd.f32 %v1135_v53, %v1044_v7  ;;  %v1867_v40 = vld [vmem:[%s2565_s2 + $0x8c] ss:$16 sps:$4 sm:$0xff]   ;;  %v1868_v41 = vld [vmem:[%s2565_s2 + $0x80] ss:$16 sps:$4 sm:$0xff]   ;;  %v1869_v42 = vld [vmem:[%s2565_s2 + $0x88] ss:$16 sps:$4 sm:$0xff]  }
 0x5f2   :  { %v1144_v51 = vmul.f32 0.5, %v1140_v45  ;;  %v1167_v49 = vld [vmem:[#allocation2 + $0x30] sm:$0x30] }
 0x5f3   :  { %v1148_v34 = vmul.f32 0.5, %v1141_v50  ;;  %v1153_v23 = vmul.f32 0.5, %v1143_v22 }
 0x5f4   :  { %1822 = vtanh.f32 %v1144_v51  ;;  %v1168_v51 = vld [vmem:[#allocation2 + $0x38] sm:$0x30] }
 0x5f5   :  { %1824 = vtanh.f32 %v1148_v34 }
 0x5f6   :  { %1826 = vtanh.f32 %v1142_v35 }
 0x5f7   :  { %1828 = vtanh.f32 %v1153_v23 }
 0x5fe   :  { %v1823_v24 = vpop.eup %1822 }
 0x5ff   :  { %v1825_v25 = vpop.eup %1824  ;;  %v1146_v8 = vadd.f32 1.0, %v1823_v24 }
 0x600   :  { %v1150_v26 = vadd.f32 1.0, %v1825_v25  ;;  %v1827_v29 = vpop.eup %1826 }
 0x601   :  { %v1147_v27 = vmul.f32 0.5, %v1146_v8  ;;  %v1829_v4 = vpop.eup %1828 }
 0x602   :  { %v1151_v30 = vmul.f32 0.5, %v1150_v26  ;;  %v1155_v18 = vadd.f32 1.0, %v1829_v4 }
 0x603   :  { %v1161_v32 = vmul.f32 %v1827_v29, %v1147_v27 }
 0x604   :  { %v1160_v33 = vmul.f32 %v1158_v31, %v1151_v30  ;;  %v1156_v5 = vmul.f32 0.5, %v1155_v18 }
 0x606   :  { %v2424_v3 = vadd.f32 %v1161_v32, %v1160_v33 }
 0x608   :  { %1830 = vtanh.f32 %v2424_v3  ;;  %v1285_v8 = vrot.slane %v2424_v3, 6  ;;  %v1420_v3 = vld [vmem:[%s2567_s4 + $0x8] sm:$0xff] }
 0x612   :  { %v1831_v6 = vpop.eup %1830 }
 0x613   :  { %v1164_v9 = vmul.f32 %v1831_v6, %v1156_v5  ;;  %v1419_v6 = vld [vmem:[%s2567_s4] sm:$0xff] }
 0x615   :  { %v1169_v10 = vpack.c.bf16 %v1164_v9, %v1164_v9  ;;  %v1649_v9 = vpack.c.bf16 %v1420_v3, %v1419_v6 }
 0x617   :  { %v1171_v11 = vrot.slane %v1169_v10, 1  ;;  %v1895_v10 = vmov 0.0|0.0  }
 0x619   :  { %1206 = vmatmul.mubr.bf16.vlgmr.msra.gmra.mrb[24].mxu0 %v1171_v11  ;;  %1247 = vmatmul.mubr.bf16.vlgmr.msra.gmra.mrb[24].mxu1 %v1171_v11  ;;  %v1421_v11 = vld [vmem:[%s2567_s4 + $0x10] sm:$0xff] }
 0x61a   :  { %1301 = vmatpush1.bf16.msra.mxu0 %v1852_v12  ;;  %1342 = vmatpush1.bf16.msra.mxu1 %v1853_v13  ;;  %v1422_v12 = vld [vmem:[%s2567_s4 + $0x18] sm:$0xff] }
 0x61b   :  { %1302 = vmatprep.subr.bf16.mxu0 %v1854_v14  ;;  %1343 = vmatprep.subr.bf16.mxu1 %v1855_v15  ;;  %v1652_v13 = vpack.c.bf16 %v1422_v12, %v1421_v11  ;;  %v1423_v14 = vld [vmem:[%s2567_s4 + $0x20] sm:$0xff]  ;;  %v1424_v15 = vld [vmem:[%s2567_s4 + $0x28] sm:$0xff] }
 0x61c   :  { %1332 = vmatprep.mubr.bf16.mxu0 %v1894_v2  ;;  %1373 = vmatprep.mubr.bf16.mxu1 %v1894_v2  ;;  %v1860_v2 = vld [vmem:[%s2565_s2 + $0x40] ss:$16 sps:$4 sm:$0xff]  }
 0x61e   :  { %1303 = vmatpush1.bf16.msra.mxu0 %v1856_v28  ;;  %1344 = vmatpush1.bf16.msra.mxu1 %v1857_v16  ;;  %v1655_v28 = vpack.c.bf16 %v1424_v15, %v1423_v14  ;;  %v1425_v16 = vld [vmem:[%s2567_s4 + $0x30] sm:$0xff] }
 0x61f   :  { %1304 = vmatprep.subr.bf16.mxu0 %v1858_v17  ;;  %1345 = vmatprep.subr.bf16.mxu1 %v1859_v19  ;;  %v1426_v17 = vld [vmem:[%s2567_s4 + $0x38] sm:$0xff]  ;;  %v1427_v19 = vld [vmem:[%s2567_s4 + $0x40] sm:$0xff] }
 0x622   :  { %1305 = vmatpush1.bf16.msra.mxu0 %v1860_v2  ;;  %1346 = vmatpush1.bf16.msra.mxu1 %v1861_v20  ;;  %v1658_v2 = vpack.c.bf16 %v1426_v17, %v1425_v16  ;;  %v1428_v20 = vld [vmem:[%s2567_s4 + $0x48] sm:$0xff] }
 0x623   :  { %1306 = vmatprep.subr.bf16.mxu0 %v1862_v21  ;;  %1347 = vmatprep.subr.bf16.mxu1 %v1863_v36  ;;  %v1897_v21 = vmov 0.0   ;;  %v1661_v36 = vpack.c.bf16 %v1428_v20, %v1427_v19 }
 0x626   :  { %1307 = vmatpush1.bf16.msra.mxu0 %v1864_v37  ;;  %1348 = vmatpush1.bf16.msra.mxu1 %v1865_v38  ;;  %v1429_v37 = vld [vmem:[%s2567_s4 + $0x50] sm:$0xff]  ;;  %v1430_v38 = vld [vmem:[%s2567_s4 + $0x58] sm:$0xff] }
 0x627   :  { %1308 = vmatprep.subr.bf16.mxu0 %v1866_v39  ;;  %1349 = vmatprep.subr.bf16.mxu1 %v1867_v40  ;;  %v1664_v39 = vpack.c.bf16 %v1430_v38, %v1429_v37  ;;  %v1431_v40 = vld [vmem:[%s2567_s4 + $0x60] sm:$0xff] }
 0x62a   :  { %1309 = vmatpush1.bf16.msra.mxu0 %v1868_v41  ;;  %1350 = vmatpush1.bf16.msra.mxu1 %v1869_v42  ;;  %v1432_v41 = vld [vmem:[%s2567_s4 + $0x68] sm:$0xff] }
 0x62b   :  { %1310 = vmatprep.subr.bf16.mxu0 %v2158_v54  ;;  %1351 = vmatprep.subr.bf16.mxu1 %v2163_v55  ;;  %v1667_v42 = vpack.c.bf16 %v1432_v41, %v1431_v40 }
 0x62e   :  { %1311 = vmatpush1.bf16.msra.mxu0 %v2170_v56  ;;  %1352 = vmatpush1.bf16.msra.mxu1 %v2175_v57 }
 0x62f   :  { %1312 = vmatprep.subr.bf16.mxu0 %v2182_v58  ;;  %1353 = vmatprep.subr.bf16.mxu1 %v2187_v59  ;;  %v1165_v58 = vld [vmem:[#allocation2 + $0x20] sm:$0x30] }
 0x632   :  { %1313 = vmatpush1.bf16.msra.mxu0 %v2194_v60  ;;  %1354 = vmatpush1.bf16.msra.mxu1 %v2199_v61  ;;  %v1166_v61 = vld [vmem:[#allocation2 + $0x28] sm:$0x30] }
 0x633   :  { %1314 = vmatprep.subr.bf16.mxu0 %v2206_v62  ;;  %1355 = vmatprep.subr.bf16.mxu1 %v2211_v63 }
 0x636   :  { %1315 = vmatpush1.bf16.msra.mxu0 %v2218_v0  ;;  %1356 = vmatpush1.bf16.msra.mxu1 %v2223_v1 }
 0x637   :  { %1648 = vmatprep.subr.bf16.mxu0 %v1895_v10 }
 0x6ec   :  { %v1207_v54 = vpop.f32.mrb[24].mxu0  ;;  %v1248_v55 = vpop.f32.mrb[24].mxu1 }
 0x6ed   :  { %v1259_v56 = vrot.slane %v1207_v54, 4  ;;  %v1209_v57 = vpop.f32.mrb[25].mxu0  ;;  %v1250_v43 = vpop.f32.mrb[25].mxu1  ;;  %v1261_v46 = vrot.slane %v1248_v55, 4  ;;  %v1433_v54 = vld [vmem:[%s2567_s4 + $0x70] sm:$0xff]  ;;  %v1434_v55 = vld [vmem:[%s2567_s4 + $0x78] sm:$0xff] }
 0x6ee   :  { %v1260_v44 = vrot.slane %v1209_v57, 4  ;;  %v1211_v59 = vpop.f32.mrb[26].mxu0  ;;  %v1252_v45 = vpop.f32.mrb[26].mxu1  ;;  %v1262_v50 = vrot.slane %v1250_v43, 4 }
 0x6ef   :  { %v1267_v60 = vadd.f32 %v1259_v56, %v1165_v58  ;;  %v1212_v47 = vpop.f32.mrb[27].mxu0  ;;  %v1253_v62 = vpop.f32.mrb[27].mxu1  ;;  %v1269_v1 = vadd.f32 %v1261_v46, %v1167_v49  ;;  %v1670_v56 = vpack.c.bf16 %v1434_v55, %v1433_v54  ;;  %v1292_v45 = vld [vmem:[#allocation2 + $0x20] sm:$0xc0] }
 0x6f0   :  { %v1268_v48 = vadd.f32 %v1260_v44, %v1166_v61  ;;  %v1270_v52 = vadd.f32 %v1262_v50, %v1168_v51  ;;  %v1294_v50 = vld [vmem:[#allocation2 + $0x30] sm:$0xc0] }
 0x6f1   :  { %v1271_v63 = vmul.f32 0.5, %v1267_v60 }
 0x6f2   :  { %v1275_v0 = vmul.f32 0.5, %v1268_v48  ;;  %v1280_v34 = vmul.f32 0.5, %v1270_v52  ;;  %v1293_v48 = vld [vmem:[#allocation2 + $0x28] sm:$0xc0] }
 0x6f3   :  { %1832 = vtanh.f32 %v1271_v63 }
 0x6f4   :  { %1834 = vtanh.f32 %v1275_v0 }
 0x6f5   :  { %1836 = vtanh.f32 %v1269_v1 }
 0x6f6   :  { %1838 = vtanh.f32 %v1280_v34 }
 0x6fd   :  { %v1833_v35 = vpop.eup %1832 }
 0x6fe   :  { %v1835_v53 = vpop.eup %1834  ;;  %v1273_v7 = vadd.f32 1.0, %v1833_v35  ;;  %v1295_v35 = vld [vmem:[#allocation2 + $0x38] sm:$0xc0] }
 0x6ff   :  { %v1277_v22 = vadd.f32 1.0, %v1835_v53  ;;  %v1837_v24 = vpop.eup %1836 }
 0x700   :  { %v1274_v23 = vmul.f32 0.5, %v1273_v7  ;;  %v1839_v30 = vpop.eup %1838 }
 0x701   :  { %v1278_v25 = vmul.f32 0.5, %v1277_v22  ;;  %v1282_v31 = vadd.f32 1.0, %v1839_v30 }
 0x702   :  { %v1288_v26 = vmul.f32 %v1837_v24, %v1274_v23 }
 0x703   :  { %v1287_v27 = vmul.f32 %v1285_v8, %v1278_v25  ;;  %v1283_v32 = vmul.f32 0.5, %v1282_v31 }
 0x705   :  { %v2496_v29 = vadd.f32 %v1288_v26, %v1287_v27 }
 0x707   :  { %1840 = vtanh.f32 %v2496_v29  ;;  %v1412_v30 = vrot.slane %v2496_v29, 6 }
 0x711   :  { %v1841_v33 = vpop.eup %1840 }
 0x712   :  { %v1291_v4 = vmul.f32 %v1841_v33, %v1283_v32 }
 0x714   :  { %v1296_v18 = vpack.c.bf16 %v1291_v4, %v1291_v4 }
 0x716   :  { %v1298_v5 = vrot.slane %v1296_v18, 2 }
 0x718   :  { %1333 = vmatmul.mubr.bf16.vlgmr.msra.gmra.mrb[28].mxu0 %v1298_v5  ;;  %1374 = vmatmul.mubr.bf16.vlgmr.msra.gmra.mrb[28].mxu1 %v1298_v5 }
 0x719   :  { %1650 = vmatpush3.bf16.msra.mxu0 %v1649_v9  ;;  %1645 = vmatprep.mubr.msk.f32.mxu0 %vm1896_vm0, %v1897_v21 }
 0x71a   :  { %1651 = vmatprep.subr.bf16.mxu0 %v1895_v10 }
 0x71d   :  { %1653 = vmatpush3.bf16.msra.mxu0 %v1652_v13 }
 0x71e   :  { %1654 = vmatprep.subr.bf16.mxu0 %v1895_v10 }
 0x721   :  { %1656 = vmatpush3.bf16.msra.mxu0 %v1655_v28 }
 0x722   :  { %1657 = vmatprep.subr.bf16.mxu0 %v1895_v10 }
 0x725   :  { %1659 = vmatpush3.bf16.msra.mxu0 %v1658_v2 }
 0x726   :  { %1660 = vmatprep.subr.bf16.mxu0 %v1895_v10 }
 0x729   :  { %1662 = vmatpush3.bf16.msra.mxu0 %v1661_v36 }
 0x72a   :  { %1663 = vmatprep.subr.bf16.mxu0 %v1895_v10 }
 0x72d   :  { %1665 = vmatpush3.bf16.msra.mxu0 %v1664_v39 }
 0x72e   :  { %1666 = vmatprep.subr.bf16.mxu0 %v1895_v10 }
 0x731   :  { %1668 = vmatpush3.bf16.msra.mxu0 %v1667_v42 }
 0x732   :  { %1669 = vmatprep.subr.bf16.mxu0 %v1895_v10  ;;  %v1595_v10 = vld [vmem:[%s2568_s5] ss:$0 sm:$0xff] }
 0x735   :  { %1671 = vmatpush3.bf16.msra.mxu0 %v1670_v56 }
 0x7eb   :  { %v1334_v57 = vpop.f32.mrb[28].mxu0  ;;  %v1375_v43 = vpop.f32.mrb[28].mxu1 }
 0x7ec   :  { %v1386_v58 = vrot.slane %v1334_v57, 2  ;;  %v1336_v44 = vpop.f32.mrb[29].mxu0  ;;  %v1377_v59 = vpop.f32.mrb[29].mxu1  ;;  %v1388_v62 = vrot.slane %v1375_v43, 2 }
 0x7ed   :  { %v1387_v60 = vrot.slane %v1336_v44, 2  ;;  %v1338_v46 = vpop.f32.mrb[30].mxu0  ;;  %v1379_v61 = vpop.f32.mrb[30].mxu1  ;;  %v1389_v34 = vrot.slane %v1377_v59, 2 }
 0x7ee   :  { %v1394_v47 = vadd.f32 %v1386_v58, %v1292_v45  ;;  %v1339_v63 = vpop.f32.mrb[31].mxu0  ;;  %v1380_v49 = vpop.f32.mrb[31].mxu1  ;;  %v1396_v52 = vadd.f32 %v1388_v62, %v1294_v50 }
 0x7ef   :  { %v1395_v0 = vadd.f32 %v1387_v60, %v1293_v48  ;;  %v1397_v53 = vadd.f32 %v1389_v34, %v1295_v35 }
 0x7f0   :  { %v1398_v1 = vmul.f32 0.5, %v1394_v47 }
 0x7f1   :  { %v1402_v51 = vmul.f32 0.5, %v1395_v0  ;;  %v1407_v7 = vmul.f32 0.5, %v1397_v53 }
 0x7f2   :  { %1842 = vtanh.f32 %v1398_v1 }
 0x7f3   :  { %1844 = vtanh.f32 %v1402_v51 }
 0x7f4   :  { %1846 = vtanh.f32 %v1396_v52 }
 0x7f5   :  { %1848 = vtanh.f32 %v1407_v7 }
 0x7fc   :  { %v1843_v22 = vpop.eup %1842 }
 0x7fd   :  { %v1845_v23 = vpop.eup %1844  ;;  %v1400_v24 = vadd.f32 1.0, %v1843_v22 }
 0x7fe   :  { %v1404_v25 = vadd.f32 1.0, %v1845_v23  ;;  %v1847_v26 = vpop.eup %1846 }
 0x7ff   :  { %v1401_v8 = vmul.f32 0.5, %v1400_v24  ;;  %v1849_v4 = vpop.eup %1848 }
 0x800   :  { %v1405_v27 = vmul.f32 0.5, %v1404_v25  ;;  %v1409_v18 = vadd.f32 1.0, %v1849_v4 }
 0x801   :  { %v1415_v31 = vmul.f32 %v1847_v26, %v1401_v8 }
 0x802   :  { %v1414_v32 = vmul.f32 %v1412_v30, %v1405_v27  ;;  %v1410_v5 = vmul.f32 0.5, %v1409_v18 }
 0x804   :  { %v1416_v33 = vadd.f32 %v1415_v31, %v1414_v32 }
 0x806   :  { %1850 = vtanh.f32 %v1416_v33 }
 0x810   :  { %v1851_v6 = vpop.eup %1850 }
 0x811   :  { %v1418_v3 = vmul.f32 %v1851_v6, %v1410_v5 }
 0x813   :  { %v1443_v9 = vrot.slane %v1418_v3, 6 }
 0x815   :  { %1646 = vmatmul.mubr.f32.vlgmr.msra.gmra.mrb[32].mxu0 %v1443_v9 }
 0x8e8   :  { %v1511_v11 = vpop.f32.mrb[32].mxu0 }
 0x8e9   :  { %v1512_v12 = vadd.f32 %v1595_v10, %v1511_v11  ;;  %v1647_v29 = vpop.f32.mrb[33].mxu0 }
 0x8eb   :  { %1515 = vst [vmem:[#allocation3] sm:$0x3] %v1512_v12 }
 0x8ec   :  { %1881 = shalt.err (!%p1878_p4)
}
 0x8ed   :  { %s1882_s18 = scalar_lea.hbm %s2569_s6, 32 }
 0x8ee   :  { %p1883_p5 = scmp.ne.s32.totalorder %s2569_s6, %s1882_s18  ;;  %p1886_p6 = scmp.lt.u32.totalorder %s1882_s18, %s2569_s6 }
 0x8f0   :  { %p1888_p7 = pnand %p1886_p6, %p1883_p5 }
 0x8f2   :  { %1891 = shalt.err (!%p1888_p7)
}
 0x8f3   :  { %1525 = dma.vmem_to_hbm [thread:$0]  %s1523_s16, 32, %s2569_s6, [#allocation4]  }
 0x8f4   :  { %1892 = dma.done.wait [#allocation4], 32  }
 0x8f5   :  { %1893 = vsyncadd [#allocation4], 4294967264 }
 0x8f6   :  { %1529 = vsyncpa [#allocation4], 1 }

</bundles_post_ra>
